<compile_context>
chip_gen: v7x
topology: tpu7x:2x2x1
jax: 0.10.0
libtpu: 0.0.40
codegen_flags: <defaults>
</compile_context>

<pallas_src>
import math
from functools import partial

import jax
import jax.numpy as jnp
from jax.experimental import pallas as pl
from jax.experimental.pallas import tpu as pltpu

# ---------------- small synthetic config (ALBERT-like) ----------------
VOCAB = 64
TYPE_VOCAB = 2
MAX_POS = 16
EMB = 16            # ALBERT embedding_size
HID = 32            # hidden_size
HEADS = 4
HEAD_DIM = HID // HEADS
INTER = 64          # intermediate_size
LAYERS = 2          # num_hidden_layers (weights shared across layers, ALBERT-style)
EPS = 1e-12

# rows of the packed (NVEC, 128) bias / LN-vector slab
(_V_EMB_LN_G, _V_EMB_LN_B, _V_EMB_PROJ_B, _V_QKV_B, _V_AO_B, _V_ATTN_LN_G,
 _V_ATTN_LN_B, _V_FFN_B, _V_FFO_B, _V_FFN_LN_G, _V_FFN_LN_B, _V_REG_W,
 _V_REG_B) = range(13)
NVEC = 13


# ---------------- fused forward kernel (one batch row per grid step) ----------------
def _fused_forward_kernel(
    # per-batch inputs
    ids_ref, tt_ref, am_ref,
    # embedding tables + weight matrices (grid-invariant)
    word_emb_ref, pos_emb_ref, type_emb_ref,
    emb_proj_w_ref, qkv_w_ref, ao_w_ref, ffn_w_ref, ffo_w_ref,
    # packed LN/bias vectors (+ reg head)
    vecs_ref,
    # output
    score_ref,
    *, seq, layers):
    f32 = jnp.float32
    bf16 = jnp.bfloat16

    def dot(a, b):
        # bf16 operands -> native single-pass MXU; f32 accumulate; explicit DEFAULT
        # precision so the global 'highest' matmul config never leaks into the kernel.
        return jnp.dot(a.astype(bf16), b.astype(bf16),
                       preferred_element_type=f32,
                       precision=jax.lax.Precision.DEFAULT)

    def layer_norm(x, g, b):
        mu = jnp.mean(x, axis=-1, keepdims=True)
        var = jnp.mean(jnp.square(x - mu), axis=-1, keepdims=True)
        return (x - mu) * jax.lax.rsqrt(var + EPS) * g + b

    def vec(row, n):
        return vecs_ref[row:row + 1, 0:n]                    # (1, n) f32

    emb_ln_g = vec(_V_EMB_LN_G, EMB)
    emb_ln_b = vec(_V_EMB_LN_B, EMB)
    emb_proj_b = vec(_V_EMB_PROJ_B, HID)
    qkv_b = vec(_V_QKV_B, 3 * HID)
    ao_b = vec(_V_AO_B, HID)
    attn_ln_g = vec(_V_ATTN_LN_G, HID)
    attn_ln_b = vec(_V_ATTN_LN_B, HID)
    ffn_b = vec(_V_FFN_B, INTER)
    ffo_b = vec(_V_FFO_B, HID)
    ffn_ln_g = vec(_V_FFN_LN_G, HID)
    ffn_ln_b = vec(_V_FFN_LN_B, HID)
    reg_w = vec(_V_REG_W, HID)
    reg_b = vec(_V_REG_B, 1)

    # --- embeddings built in-kernel (no XLA gather launch) ---
    ids = ids_ref[...]                                       # (S, 1) int32
    tts = tt_ref[...].astype(f32)                            # (S, 1)
    word_oh = (jax.lax.broadcasted_iota(jnp.int32, (seq, VOCAB), 1) == ids)
    word_e = dot(word_oh.astype(f32), word_emb_ref[...])     # (S, EMB)
    # TYPE_VOCAB == 2: exact VPU lerp between the two rows (no skinny matmul)
    type_e = type_emb_ref[0:1, :] * (1.0 - tts) + type_emb_ref[1:2, :] * tts
    emb = word_e + pos_emb_ref[0:seq, :] + type_e            # (S, EMB)

    x = layer_norm(emb, emb_ln_g, emb_ln_b)
    x = dot(x, emb_proj_w_ref[...]) + emb_proj_b             # (S, HID)

    # additive padding mask for this sequence, built in-kernel: 0 keep / -1e9 masked
    add_mask = jnp.where(am_ref[...] > 0, 0.0, -1e9).astype(f32)   # (1, S)

    attn_scale = 1.0 / math.sqrt(HEAD_DIM)
    gelu_c = math.sqrt(2.0 / math.pi)

    # ALBERT shares ONE layer's weights across all layers -> fori_loop carrying x
    # keeps code size / vreg live ranges flat even when layers grows to 12.
    def layer_body(_, x):
        qkv = dot(x, qkv_w_ref[...]) + qkv_b                 # (S, 3*HID), stays in vregs
        ctx_heads = []
        for h in range(HEADS):
            q = qkv[:, h * HEAD_DIM:(h + 1) * HEAD_DIM]
            k = qkv[:, HID + h * HEAD_DIM:HID + (h + 1) * HEAD_DIM]
            v = qkv[:, 2 * HID + h * HEAD_DIM:2 * HID + (h + 1) * HEAD_DIM]
            # q @ k^T without materializing a transpose (contract dim 1 vs dim 1)
            s = jax.lax.dot_general(q.astype(bf16), k.astype(bf16),
                                    (((1,), (1,)), ((), ())),
                                    preferred_element_type=f32,
                                    precision=jax.lax.Precision.DEFAULT)
            s = s * attn_scale + add_mask                    # (S, S)
            s = s - jnp.max(s, axis=-1, keepdims=True)
            p = jnp.exp(s)
            p = p * pl.reciprocal(jnp.sum(p, axis=-1, keepdims=True), approx=True)
            ctx_heads.append(dot(p, v))                      # (S, HEAD_DIM)
        # single output projection with full K=HID contraction (no per-head folding)
        ctx = jnp.concatenate(ctx_heads, axis=-1)            # (S, HID)
        attn_out = dot(ctx, ao_w_ref[...]) + ao_b
        # attention-prob / output dropouts are identity at inference (eval mode)
        x = layer_norm(x + attn_out, attn_ln_g, attn_ln_b)

        ffn = dot(x, ffn_w_ref[...]) + ffn_b                 # (S, INTER)
        # gelu_new (tanh approximation), as used by ALBERT; f32 on the VPU/EUP
        ffn = 0.5 * ffn * (1.0 + jnp.tanh(gelu_c * (ffn + 0.044715 * ffn * ffn * ffn)))
        ffn_out = dot(ffn, ffo_w_ref[...]) + ffo_b
        return layer_norm(x + ffn_out, ffn_ln_g, ffn_ln_b)

    x = jax.lax.fori_loop(0, layers, layer_body, x)

    # --- CLS regression head on the CLS row only (dropout p=0.3 is identity in eval) ---
    cls = x[0:1, :]                                          # (1, HID)
    score_ref[...] = jnp.sum(cls * reg_w, axis=-1, keepdims=True) + reg_b


# ---------------- wrapper ----------------
def direct_model_forward(params, input_ids, attention_mask=None, token_type_ids=None):
    B, S = input_ids.shape
    if attention_mask is None:
        attention_mask = jnp.ones((B, S), jnp.int32)
    if token_type_ids is None:
        token_type_ids = jnp.zeros((B, S), jnp.int32)

    ids3 = input_ids.astype(jnp.int32).reshape(B, S, 1)
    tt3 = token_type_ids.astype(jnp.int32).reshape(B, S, 1)
    am3 = attention_mask.astype(jnp.int32).reshape(B, 1, S)

    # pack the tiny LN/bias vectors (+ regression head) into one (NVEC, 128) slab
    def row(v):
        v = v.reshape(-1).astype(jnp.float32)
        return jnp.pad(v, (0, 128 - v.shape[0])).reshape(1, 128)

    vecs = jnp.concatenate([
        row(params["emb_ln_g"]), row(params["emb_ln_b"]), row(params["emb_proj_b"]),
        row(jnp.concatenate([params["q_b"], params["k_b"], params["v_b"]])),
        row(params["ao_b"]), row(params["attn_ln_g"]), row(params["attn_ln_b"]),
        row(params["ffn_b"]), row(params["ffo_b"]),
        row(params["ffn_ln_g"]), row(params["ffn_ln_b"]),
        row(params["reg_w"]), row(params["reg_b"]),
    ], axis=0)                                               # (NVEC, 128)

    # ALBERT shared-layer Q/K/V projections fused into one (HID, 3*HID) weight
    qkv_w = jnp.concatenate([params["q_w"], params["k_w"], params["v_w"]], axis=1)

    const = lambda *_: (0, 0)                                # grid-invariant weights
    kern = partial(_fused_forward_kernel, seq=S, layers=LAYERS)
    score = pl.pallas_call(
        kern,
        grid=(B,),
        in_specs=[
            pl.BlockSpec((None, S, 1), lambda b: (b, 0, 0)),      # input_ids
            pl.BlockSpec((None, S, 1), lambda b: (b, 0, 0)),      # token_type_ids
            pl.BlockSpec((None, 1, S), lambda b: (b, 0, 0)),      # attention_mask
            pl.BlockSpec((VOCAB, EMB), const),                    # word_emb
            pl.BlockSpec((MAX_POS, EMB), const),                  # pos_emb
            pl.BlockSpec((TYPE_VOCAB, EMB), const),               # type_emb
            pl.BlockSpec((EMB, HID), const),                      # emb_proj_w
            pl.BlockSpec((HID, 3 * HID), const),                  # qkv_w (fused)
            pl.BlockSpec((HID, HID), const),                      # ao_w
            pl.BlockSpec((HID, INTER), const),                    # ffn_w
            pl.BlockSpec((INTER, HID), const),                    # ffo_w
            pl.BlockSpec((NVEC, 128), const),                     # packed vectors
        ],
        out_specs=pl.BlockSpec((None, 1, 1), lambda b: (b, 0, 0)),
        out_shape=jax.ShapeDtypeStruct((B, 1, 1), jnp.float32),
        compiler_params=pltpu.CompilerParams(
            dimension_semantics=("parallel",)),                   # shard batch over TCs (v7x)
    )(ids3, tt3, am3,
      params["word_emb"], params["pos_emb"], params["type_emb"],
      params["emb_proj_w"], qkv_w, params["ao_w"],
      params["ffn_w"], params["ffo_w"], vecs)
    return score.reshape(B, 1)


# ---------------- parameters (deterministic init) ----------------
def init_params(key):
    ks = jax.random.split(key, 12)

    def w(k, shape, scale=0.02):
        return (scale * jax.random.normal(k, shape)).astype(jnp.float32)

    return {
        "word_emb": w(ks[0], (VOCAB, EMB)),
        "pos_emb": w(ks[1], (MAX_POS, EMB)),
        "type_emb": w(ks[2], (TYPE_VOCAB, EMB)),
        "emb_ln_g": jnp.ones((EMB,), jnp.float32),
        "emb_ln_b": jnp.zeros((EMB,), jnp.float32),
        "emb_proj_w": w(ks[3], (EMB, HID)),
        "emb_proj_b": jnp.zeros((HID,), jnp.float32),
        "q_w": w(ks[4], (HID, HID)), "q_b": jnp.zeros((HID,), jnp.float32),
        "k_w": w(ks[5], (HID, HID)), "k_b": jnp.zeros((HID,), jnp.float32),
        "v_w": w(ks[6], (HID, HID)), "v_b": jnp.zeros((HID,), jnp.float32),
        "ao_w": w(ks[7], (HID, HID)), "ao_b": jnp.zeros((HID,), jnp.float32),
        "attn_ln_g": jnp.ones((HID,), jnp.float32),
        "attn_ln_b": jnp.zeros((HID,), jnp.float32),
        "ffn_w": w(ks[8], (HID, INTER)), "ffn_b": jnp.zeros((INTER,), jnp.float32),
        "ffo_w": w(ks[9], (INTER, HID)), "ffo_b": jnp.zeros((HID,), jnp.float32),
        "ffn_ln_g": jnp.ones((HID,), jnp.float32),
        "ffn_ln_b": jnp.zeros((HID,), jnp.float32),
        "reg_w": w(ks[10], (HID, 1)), "reg_b": jnp.zeros((1,), jnp.float32),
    }


# ---------------- pure-JAX reference (exact f32, HF-style per-batch softmax) ----------------
def _reference_forward(params, input_ids, attention_mask, token_type_ids):
    B, S = input_ids.shape
    emb = (params["word_emb"][input_ids]
           + params["pos_emb"][jnp.arange(S)][None, :, :]
           + params["type_emb"][token_type_ids])

    def ln(x, g, b):
        mu = x.mean(-1, keepdims=True)
        var = ((x - mu) ** 2).mean(-1, keepdims=True)
        return (x - mu) / jnp.sqrt(var + EPS) * g + b

    x = ln(emb, params["emb_ln_g"], params["emb_ln_b"])
    x = x @ params["emb_proj_w"] + params["emb_proj_b"]
    add_mask = (1.0 - attention_mask.astype(jnp.float32)) * -1e9
    c = math.sqrt(2.0 / math.pi)
    for _ in range(LAYERS):
        q = (x @ params["q_w"] + params["q_b"]).reshape(B, S, HEADS, HEAD_DIM)
        k = (x @ params["k_w"] + params["k_b"]).reshape(B, S, HEADS, HEAD_DIM)
        v = (x @ params["v_w"] + params["v_b"]).reshape(B, S, HEADS, HEAD_DIM)
        s = jnp.einsum("bqhd,bkhd->bhqk", q, k) / math.sqrt(HEAD_DIM)
        s = s + add_mask[:, None, None, :]
        p = jax.nn.softmax(s, axis=-1)
        ctx = jnp.einsum("bhqk,bkhd->bqhd", p, v).reshape(B, S, HID)
        attn_out = ctx @ params["ao_w"] + params["ao_b"]
        x = ln(x + attn_out, params["attn_ln_g"], params["attn_ln_b"])
        ffn = x @ params["ffn_w"] + params["ffn_b"]
        ffn = 0.5 * ffn * (1.0 + jnp.tanh(c * (ffn + 0.044715 * ffn ** 3)))
        x = ln(x + ffn @ params["ffo_w"] + params["ffo_b"],
               params["ffn_ln_g"], params["ffn_ln_b"])
    cls = x[:, 0, :]
    return cls @ params["reg_w"] + params["reg_b"]


if __name__ == "__main__":
    # 'highest' only makes the pure-JAX reference exact f32; the kernel's dots use
    # explicit bf16 operands + Precision.DEFAULT, so this config cannot leak in.
    jax.config.update("jax_default_matmul_precision", "highest")
    key = jax.random.PRNGKey(0)
    pkey, dkey = jax.random.split(key)
    params = init_params(pkey)

    B, S = 2, 8
    input_ids = jax.random.randint(dkey, (B, S), 0, VOCAB, dtype=jnp.int32)
    attention_mask = jnp.ones((B, S), jnp.int32).at[1, -2:].set(0)   # exercise padding mask
    token_type_ids = jnp.zeros((B, S), jnp.int32).at[:, S // 2:].set(1)

    score = jax.jit(direct_model_forward)(params, input_ids, attention_mask,
                                          token_type_ids)
    jax.block_until_ready(score)
    assert score.shape == (B, 1) and score.dtype == jnp.float32

    ref = _reference_forward(params, input_ids, attention_mask, token_type_ids)
    assert jnp.allclose(score, ref, atol=1e-2, rtol=5e-2), (score, ref)
    print("KERNEL_OK")
</pallas_src>

<mosaic_0001>
module attributes {stable_mosaic.version = 11 : i64} {
  func.func @_fused_forward_kernel(%arg0: i32, %arg1: memref<1x8x1xi32, #tpu.memory_space<vmem>>, %arg2: memref<1x8x1xi32, #tpu.memory_space<vmem>>, %arg3: memref<1x1x8xi32, #tpu.memory_space<vmem>>, %arg4: memref<64x16xf32, #tpu.memory_space<vmem>>, %arg5: memref<16x16xf32, #tpu.memory_space<vmem>>, %arg6: memref<2x16xf32, #tpu.memory_space<vmem>>, %arg7: memref<16x32xf32, #tpu.memory_space<vmem>>, %arg8: memref<32x96xf32, #tpu.memory_space<vmem>>, %arg9: memref<32x32xf32, #tpu.memory_space<vmem>>, %arg10: memref<32x64xf32, #tpu.memory_space<vmem>>, %arg11: memref<64x32xf32, #tpu.memory_space<vmem>>, %arg12: memref<13x128xf32, #tpu.memory_space<vmem>>, %arg13: memref<1x1x1xf32, #tpu.memory_space<vmem>>) attributes {dimension_semantics = [#tpu.dimension_semantics<parallel>], iteration_bounds = array<i64: 2>, scalar_prefetch = 0 : i64, scratch_operands = 0 : i64, tpu.core_type = #tpu.core_type<tc>, window_params = [{transform_indices = @transform_0, window_bounds = array<i64: 1, 8, 1>}, {transform_indices = @transform_1, window_bounds = array<i64: 1, 8, 1>}, {transform_indices = @transform_2, window_bounds = array<i64: 1, 1, 8>}, {pipeline_mode = #tpu.pipeline_mode<synchronous>, transform_indices = @transform_3, window_bounds = array<i64: 64, 16>}, {pipeline_mode = #tpu.pipeline_mode<synchronous>, transform_indices = @transform_4, window_bounds = array<i64: 16, 16>}, {pipeline_mode = #tpu.pipeline_mode<synchronous>, transform_indices = @transform_5, window_bounds = array<i64: 2, 16>}, {pipeline_mode = #tpu.pipeline_mode<synchronous>, transform_indices = @transform_6, window_bounds = array<i64: 16, 32>}, {pipeline_mode = #tpu.pipeline_mode<synchronous>, transform_indices = @transform_7, window_bounds = array<i64: 32, 96>}, {pipeline_mode = #tpu.pipeline_mode<synchronous>, transform_indices = @transform_8, window_bounds = array<i64: 32, 32>}, {pipeline_mode = #tpu.pipeline_mode<synchronous>, transform_indices = @transform_9, window_bounds = array<i64: 32, 64>}, {pipeline_mode = #tpu.pipeline_mode<synchronous>, transform_indices = @transform_10, window_bounds = array<i64: 64, 32>}, {pipeline_mode = #tpu.pipeline_mode<synchronous>, transform_indices = @transform_11, window_bounds = array<i64: 13, 128>}, {transform_indices = @transform_12, window_bounds = array<i64: 1, 1, 1>}]} {
    %c0 = arith.constant 0 : index
    %c0_0 = arith.constant 0 : index
    %0 = vector.load %arg12[%c0, %c0_0] : memref<13x128xf32, #tpu.memory_space<vmem>>, vector<1x16xf32>
    %c1 = arith.constant 1 : index
    %c0_1 = arith.constant 0 : index
    %1 = vector.load %arg12[%c1, %c0_1] : memref<13x128xf32, #tpu.memory_space<vmem>>, vector<1x16xf32>
    %c2 = arith.constant 2 : index
    %c0_2 = arith.constant 0 : index
    %2 = vector.load %arg12[%c2, %c0_2] : memref<13x128xf32, #tpu.memory_space<vmem>>, vector<1x32xf32>
    %c3 = arith.constant 3 : index
    %c0_3 = arith.constant 0 : index
    %3 = vector.load %arg12[%c3, %c0_3] : memref<13x128xf32, #tpu.memory_space<vmem>>, vector<1x96xf32>
    %c4 = arith.constant 4 : index
    %c0_4 = arith.constant 0 : index
    %4 = vector.load %arg12[%c4, %c0_4] : memref<13x128xf32, #tpu.memory_space<vmem>>, vector<1x32xf32>
    %c5 = arith.constant 5 : index
    %c0_5 = arith.constant 0 : index
    %5 = vector.load %arg12[%c5, %c0_5] : memref<13x128xf32, #tpu.memory_space<vmem>>, vector<1x32xf32>
    %c6 = arith.constant 6 : index
    %c0_6 = arith.constant 0 : index
    %6 = vector.load %arg12[%c6, %c0_6] : memref<13x128xf32, #tpu.memory_space<vmem>>, vector<1x32xf32>
    %c7 = arith.constant 7 : index
    %c0_7 = arith.constant 0 : index
    %7 = vector.load %arg12[%c7, %c0_7] : memref<13x128xf32, #tpu.memory_space<vmem>>, vector<1x64xf32>
    %c8 = arith.constant 8 : index
    %c0_8 = arith.constant 0 : index
    %8 = vector.load %arg12[%c8, %c0_8] : memref<13x128xf32, #tpu.memory_space<vmem>>, vector<1x32xf32>
    %c9 = arith.constant 9 : index
    %c0_9 = arith.constant 0 : index
    %9 = vector.load %arg12[%c9, %c0_9] : memref<13x128xf32, #tpu.memory_space<vmem>>, vector<1x32xf32>
    %c10 = arith.constant 10 : index
    %c0_10 = arith.constant 0 : index
    %10 = vector.load %arg12[%c10, %c0_10] : memref<13x128xf32, #tpu.memory_space<vmem>>, vector<1x32xf32>
    %c11 = arith.constant 11 : index
    %c0_11 = arith.constant 0 : index
    %11 = vector.load %arg12[%c11, %c0_11] : memref<13x128xf32, #tpu.memory_space<vmem>>, vector<1x32xf32>
    %c12 = arith.constant 12 : index
    %c0_12 = arith.constant 0 : index
    %12 = vector.load %arg12[%c12, %c0_12] : memref<13x128xf32, #tpu.memory_space<vmem>>, vector<1x1xf32>
    %c0_13 = arith.constant 0 : index
    %c0_14 = arith.constant 0 : index
    %c0_15 = arith.constant 0 : index
    %13 = vector.load %arg1[%c0_13, %c0_14, %c0_15] : memref<1x8x1xi32, #tpu.memory_space<vmem>>, vector<1x8x1xi32>
    %14 = vector.shape_cast %13 : vector<1x8x1xi32> to vector<8x1xi32>
    %c0_16 = arith.constant 0 : index
    %c0_17 = arith.constant 0 : index
    %c0_18 = arith.constant 0 : index
    %15 = vector.load %arg2[%c0_16, %c0_17, %c0_18] : memref<1x8x1xi32, #tpu.memory_space<vmem>>, vector<1x8x1xi32>
    %16 = vector.shape_cast %15 : vector<1x8x1xi32> to vector<8x1xi32>
    %17 = arith.sitofp %16 : vector<8x1xi32> to vector<8x1xf32>
    %18 = tpu.iota {dimensions = array<i32: 1>} : vector<8x64xi32>
    %19 = vector.broadcast %14 : vector<8x1xi32> to vector<8x64xi32>
    %20 = arith.cmpi eq, %18, %19 : vector<8x64xi32>
    %21 = arith.extui %20 : vector<8x64xi1> to vector<8x64xi32>
    %22 = arith.sitofp %21 : vector<8x64xi32> to vector<8x64xf32>
    %c0_19 = arith.constant 0 : index
    %c0_20 = arith.constant 0 : index
    %23 = vector.load %arg4[%c0_19, %c0_20] : memref<64x16xf32, #tpu.memory_space<vmem>>, vector<64x16xf32>
    %24 = arith.truncf %22 : vector<8x64xf32> to vector<8x64xbf16>
    %25 = arith.truncf %23 : vector<64x16xf32> to vector<64x16xbf16>
    %cst = arith.constant dense<0.000000e+00> : vector<8x16xf32>
    %26 = tpu.matmul %24, %25, %cst {dimension_numbers = #tpu.dot_dimension_numbers<[1], [0], [0], [1], [0, 0, 1, 1], [], []>} : vector<8x64xbf16>, vector<64x16xbf16>, vector<8x16xf32> -> vector<8x16xf32>
    %c0_21 = arith.constant 0 : index
    %c0_22 = arith.constant 0 : index
    %27 = vector.load %arg6[%c0_21, %c0_22] : memref<2x16xf32, #tpu.memory_space<vmem>>, vector<1x16xf32>
    %cst_23 = arith.constant 1.000000e+00 : f32
    %28 = vector.broadcast %cst_23 : f32 to vector<8x1xf32>
    %29 = arith.subf %28, %17 : vector<8x1xf32>
    %30 = vector.broadcast %27 : vector<1x16xf32> to vector<8x16xf32>
    %31 = vector.broadcast %29 : vector<8x1xf32> to vector<8x16xf32>
    %32 = arith.mulf %30, %31 : vector<8x16xf32>
    %c1_24 = arith.constant 1 : index
    %c0_25 = arith.constant 0 : index
    %33 = vector.load %arg6[%c1_24, %c0_25] : memref<2x16xf32, #tpu.memory_space<vmem>>, vector<1x16xf32>
    %34 = vector.broadcast %33 : vector<1x16xf32> to vector<8x16xf32>
    %35 = vector.broadcast %17 : vector<8x1xf32> to vector<8x16xf32>
    %36 = arith.mulf %34, %35 : vector<8x16xf32>
    %37 = arith.addf %32, %36 : vector<8x16xf32>
    %c0_26 = arith.constant 0 : index
    %c0_27 = arith.constant 0 : index
    %38 = vector.load %arg5[%c0_26, %c0_27] : memref<16x16xf32, #tpu.memory_space<vmem>>, vector<8x16xf32>
    %39 = arith.addf %26, %38 : vector<8x16xf32>
    %40 = arith.addf %39, %37 : vector<8x16xf32>
    %cst_28 = arith.constant dense<0.000000e+00> : vector<8xf32>
    %41 = vector.multi_reduction <add>, %40, %cst_28 [1] : vector<8x16xf32> to vector<8xf32>
    %42 = vector.shape_cast %41 : vector<8xf32> to vector<8x1xf32>
    %cst_29 = arith.constant 1.600000e+01 : f32
    %43 = vector.broadcast %cst_29 : f32 to vector<8x1xf32>
    %44 = arith.divf %42, %43 : vector<8x1xf32>
    %45 = vector.broadcast %44 : vector<8x1xf32> to vector<8x16xf32>
    %46 = arith.subf %40, %45 : vector<8x16xf32>
    %47 = arith.mulf %46, %46 : vector<8x16xf32>
    %cst_30 = arith.constant dense<0.000000e+00> : vector<8xf32>
    %48 = vector.multi_reduction <add>, %47, %cst_30 [1] : vector<8x16xf32> to vector<8xf32>
    %49 = vector.shape_cast %48 : vector<8xf32> to vector<8x1xf32>
    %cst_31 = arith.constant 1.600000e+01 : f32
    %50 = vector.broadcast %cst_31 : f32 to vector<8x1xf32>
    %51 = arith.divf %49, %50 : vector<8x1xf32>
    %52 = vector.broadcast %44 : vector<8x1xf32> to vector<8x16xf32>
    %53 = arith.subf %40, %52 : vector<8x16xf32>
    %cst_32 = arith.constant 9.99999996E-13 : f32
    %54 = vector.broadcast %cst_32 : f32 to vector<8x1xf32>
    %55 = arith.addf %51, %54 : vector<8x1xf32>
    %56 = math.rsqrt %55 : vector<8x1xf32>
    %57 = vector.broadcast %56 : vector<8x1xf32> to vector<8x16xf32>
    %58 = arith.mulf %53, %57 : vector<8x16xf32>
    %59 = vector.broadcast %0 : vector<1x16xf32> to vector<8x16xf32>
    %60 = arith.mulf %58, %59 : vector<8x16xf32>
    %61 = vector.broadcast %1 : vector<1x16xf32> to vector<8x16xf32>
    %62 = arith.addf %60, %61 : vector<8x16xf32>
    %c0_33 = arith.constant 0 : index
    %c0_34 = arith.constant 0 : index
    %63 = vector.load %arg7[%c0_33, %c0_34] : memref<16x32xf32, #tpu.memory_space<vmem>>, vector<16x32xf32>
    %64 = arith.truncf %62 : vector<8x16xf32> to vector<8x16xbf16>
    %65 = arith.truncf %63 : vector<16x32xf32> to vector<16x32xbf16>
    %cst_35 = arith.constant dense<0.000000e+00> : vector<8x32xf32>
    %66 = tpu.matmul %64, %65, %cst_35 {dimension_numbers = #tpu.dot_dimension_numbers<[1], [0], [0], [1], [0, 0, 1, 1], [], []>} : vector<8x16xbf16>, vector<16x32xbf16>, vector<8x32xf32> -> vector<8x32xf32>
    %67 = vector.broadcast %2 : vector<1x32xf32> to vector<8x32xf32>
    %68 = arith.addf %66, %67 : vector<8x32xf32>
    %c0_36 = arith.constant 0 : index
    %c0_37 = arith.constant 0 : index
    %c0_38 = arith.constant 0 : index
    %69 = vector.load %arg3[%c0_36, %c0_37, %c0_38] : memref<1x1x8xi32, #tpu.memory_space<vmem>>, vector<1x1x8xi32>
    %70 = vector.shape_cast %69 : vector<1x1x8xi32> to vector<1x8xi32>
    %c0_i32 = arith.constant 0 : i32
    %71 = vector.broadcast %c0_i32 : i32 to vector<1x8xi32>
    %72 = arith.cmpi sgt, %70, %71 : vector<1x8xi32>
    %cst_39 = arith.constant 0.000000e+00 : f32
    %cst_40 = arith.constant -1.000000e+09 : f32
    %73 = vector.broadcast %cst_39 : f32 to vector<1x8xf32>
    %74 = vector.broadcast %cst_40 : f32 to vector<1x8xf32>
    %75 = arith.select %72, %73, %74 : vector<1x8xi1>, vector<1x8xf32>
    %c0_i32_41 = arith.constant 0 : i32
    %c2_i32 = arith.constant 2 : i32
    %76 = arith.addi %c0_i32_41, %c2_i32 : i32
    %c1_i32 = arith.constant 1 : i32
    %77 = scf.for %arg14 = %c0_i32_41 to %76 step %c1_i32 iter_args(%arg15 = %68) -> (vector<8x32xf32>)  : i32 {
      %c0_46 = arith.constant 0 : index
      %c0_47 = arith.constant 0 : index
      %86 = vector.load %arg8[%c0_46, %c0_47] : memref<32x96xf32, #tpu.memory_space<vmem>>, vector<32x96xf32>
      %87 = arith.truncf %arg15 : vector<8x32xf32> to vector<8x32xbf16>
      %88 = arith.truncf %86 : vector<32x96xf32> to vector<32x96xbf16>
      %cst_48 = arith.constant dense<0.000000e+00> : vector<8x96xf32>
      %89 = tpu.matmul %87, %88, %cst_48 {dimension_numbers = #tpu.dot_dimension_numbers<[1], [0], [0], [1], [0, 0, 1, 1], [], []>} : vector<8x32xbf16>, vector<32x96xbf16>, vector<8x96xf32> -> vector<8x96xf32>
      %90 = vector.broadcast %3 : vector<1x96xf32> to vector<8x96xf32>
      %91 = arith.addf %89, %90 : vector<8x96xf32>
      %92 = vector.extract_strided_slice %91 {offsets = [0, 0], sizes = [8, 8], strides = [1, 1]} : vector<8x96xf32> to vector<8x8xf32>
      %93 = vector.extract_strided_slice %91 {offsets = [0, 32], sizes = [8, 8], strides = [1, 1]} : vector<8x96xf32> to vector<8x8xf32>
      %94 = vector.extract_strided_slice %91 {offsets = [0, 64], sizes = [8, 8], strides = [1, 1]} : vector<8x96xf32> to vector<8x8xf32>
      %95 = arith.truncf %92 : vector<8x8xf32> to vector<8x8xbf16>
      %96 = arith.truncf %93 : vector<8x8xf32> to vector<8x8xbf16>
      %cst_49 = arith.constant dense<0.000000e+00> : vector<8x8xf32>
      %97 = tpu.matmul %95, %96, %cst_49 {dimension_numbers = #tpu.dot_dimension_numbers<[1], [1], [0], [0], [0, 0, 1, 0], [], []>} : vector<8x8xbf16>, vector<8x8xbf16>, vector<8x8xf32> -> vector<8x8xf32>
      %cst_50 = arith.constant 0.353553385 : f32
      %98 = vector.broadcast %cst_50 : f32 to vector<8x8xf32>
      %99 = arith.mulf %97, %98 : vector<8x8xf32>
      %100 = vector.broadcast %75 : vector<1x8xf32> to vector<8x8xf32>
      %101 = arith.addf %99, %100 : vector<8x8xf32>
      %cst_51 = arith.constant dense<0xFF800000> : vector<8xf32>
      %102 = vector.multi_reduction <maximumf>, %101, %cst_51 [1] : vector<8x8xf32> to vector<8xf32>
      %103 = vector.shape_cast %102 : vector<8xf32> to vector<8x1xf32>
      %104 = vector.broadcast %103 : vector<8x1xf32> to vector<8x8xf32>
      %105 = arith.subf %101, %104 : vector<8x8xf32>
      %106 = math.exp %105 : vector<8x8xf32>
      %cst_52 = arith.constant dense<0.000000e+00> : vector<8xf32>
      %107 = vector.multi_reduction <add>, %106, %cst_52 [1] : vector<8x8xf32> to vector<8xf32>
      %108 = vector.shape_cast %107 : vector<8xf32> to vector<8x1xf32>
      %109 = tpu.reciprocal %108 {approx = true} : vector<8x1xf32> -> vector<8x1xf32>
      %110 = vector.broadcast %109 : vector<8x1xf32> to vector<8x8xf32>
      %111 = arith.mulf %106, %110 : vector<8x8xf32>
      %112 = arith.truncf %111 : vector<8x8xf32> to vector<8x8xbf16>
      %113 = arith.truncf %94 : vector<8x8xf32> to vector<8x8xbf16>
      %cst_53 = arith.constant dense<0.000000e+00> : vector<8x8xf32>
      %114 = tpu.matmul %112, %113, %cst_53 {dimension_numbers = #tpu.dot_dimension_numbers<[1], [0], [0], [1], [0, 0, 1, 1], [], []>} : vector<8x8xbf16>, vector<8x8xbf16>, vector<8x8xf32> -> vector<8x8xf32>
      %115 = vector.extract_strided_slice %91 {offsets = [0, 8], sizes = [8, 8], strides = [1, 1]} : vector<8x96xf32> to vector<8x8xf32>
      %116 = vector.extract_strided_slice %91 {offsets = [0, 40], sizes = [8, 8], strides = [1, 1]} : vector<8x96xf32> to vector<8x8xf32>
      %117 = vector.extract_strided_slice %91 {offsets = [0, 72], sizes = [8, 8], strides = [1, 1]} : vector<8x96xf32> to vector<8x8xf32>
      %118 = arith.truncf %115 : vector<8x8xf32> to vector<8x8xbf16>
      %119 = arith.truncf %116 : vector<8x8xf32> to vector<8x8xbf16>
      %cst_54 = arith.constant dense<0.000000e+00> : vector<8x8xf32>
      %120 = tpu.matmul %118, %119, %cst_54 {dimension_numbers = #tpu.dot_dimension_numbers<[1], [1], [0], [0], [0, 0, 1, 0], [], []>} : vector<8x8xbf16>, vector<8x8xbf16>, vector<8x8xf32> -> vector<8x8xf32>
      %cst_55 = arith.constant 0.353553385 : f32
      %121 = vector.broadcast %cst_55 : f32 to vector<8x8xf32>
      %122 = arith.mulf %120, %121 : vector<8x8xf32>
      %123 = vector.broadcast %75 : vector<1x8xf32> to vector<8x8xf32>
      %124 = arith.addf %122, %123 : vector<8x8xf32>
      %cst_56 = arith.constant dense<0xFF800000> : vector<8xf32>
      %125 = vector.multi_reduction <maximumf>, %124, %cst_56 [1] : vector<8x8xf32> to vector<8xf32>
      %126 = vector.shape_cast %125 : vector<8xf32> to vector<8x1xf32>
      %127 = vector.broadcast %126 : vector<8x1xf32> to vector<8x8xf32>
      %128 = arith.subf %124, %127 : vector<8x8xf32>
      %129 = math.exp %128 : vector<8x8xf32>
      %cst_57 = arith.constant dense<0.000000e+00> : vector<8xf32>
      %130 = vector.multi_reduction <add>, %129, %cst_57 [1] : vector<8x8xf32> to vector<8xf32>
      %131 = vector.shape_cast %130 : vector<8xf32> to vector<8x1xf32>
      %132 = tpu.reciprocal %131 {approx = true} : vector<8x1xf32> -> vector<8x1xf32>
      %133 = vector.broadcast %132 : vector<8x1xf32> to vector<8x8xf32>
      %134 = arith.mulf %129, %133 : vector<8x8xf32>
      %135 = arith.truncf %134 : vector<8x8xf32> to vector<8x8xbf16>
      %136 = arith.truncf %117 : vector<8x8xf32> to vector<8x8xbf16>
      %cst_58 = arith.constant dense<0.000000e+00> : vector<8x8xf32>
      %137 = tpu.matmul %135, %136, %cst_58 {dimension_numbers = #tpu.dot_dimension_numbers<[1], [0], [0], [1], [0, 0, 1, 1], [], []>} : vector<8x8xbf16>, vector<8x8xbf16>, vector<8x8xf32> -> vector<8x8xf32>
      %138 = vector.extract_strided_slice %91 {offsets = [0, 16], sizes = [8, 8], strides = [1, 1]} : vector<8x96xf32> to vector<8x8xf32>
      %139 = vector.extract_strided_slice %91 {offsets = [0, 48], sizes = [8, 8], strides = [1, 1]} : vector<8x96xf32> to vector<8x8xf32>
      %140 = vector.extract_strided_slice %91 {offsets = [0, 80], sizes = [8, 8], strides = [1, 1]} : vector<8x96xf32> to vector<8x8xf32>
      %141 = arith.truncf %138 : vector<8x8xf32> to vector<8x8xbf16>
      %142 = arith.truncf %139 : vector<8x8xf32> to vector<8x8xbf16>
      %cst_59 = arith.constant dense<0.000000e+00> : vector<8x8xf32>
      %143 = tpu.matmul %141, %142, %cst_59 {dimension_numbers = #tpu.dot_dimension_numbers<[1], [1], [0], [0], [0, 0, 1, 0], [], []>} : vector<8x8xbf16>, vector<8x8xbf16>, vector<8x8xf32> -> vector<8x8xf32>
      %cst_60 = arith.constant 0.353553385 : f32
      %144 = vector.broadcast %cst_60 : f32 to vector<8x8xf32>
      %145 = arith.mulf %143, %144 : vector<8x8xf32>
      %146 = vector.broadcast %75 : vector<1x8xf32> to vector<8x8xf32>
      %147 = arith.addf %145, %146 : vector<8x8xf32>
      %cst_61 = arith.constant dense<0xFF800000> : vector<8xf32>
      %148 = vector.multi_reduction <maximumf>, %147, %cst_61 [1] : vector<8x8xf32> to vector<8xf32>
      %149 = vector.shape_cast %148 : vector<8xf32> to vector<8x1xf32>
      %150 = vector.broadcast %149 : vector<8x1xf32> to vector<8x8xf32>
      %151 = arith.subf %147, %150 : vector<8x8xf32>
      %152 = math.exp %151 : vector<8x8xf32>
      %cst_62 = arith.constant dense<0.000000e+00> : vector<8xf32>
      %153 = vector.multi_reduction <add>, %152, %cst_62 [1] : vector<8x8xf32> to vector<8xf32>
      %154 = vector.shape_cast %153 : vector<8xf32> to vector<8x1xf32>
      %155 = tpu.reciprocal %154 {approx = true} : vector<8x1xf32> -> vector<8x1xf32>
      %156 = vector.broadcast %155 : vector<8x1xf32> to vector<8x8xf32>
      %157 = arith.mulf %152, %156 : vector<8x8xf32>
      %158 = arith.truncf %157 : vector<8x8xf32> to vector<8x8xbf16>
      %159 = arith.truncf %140 : vector<8x8xf32> to vector<8x8xbf16>
      %cst_63 = arith.constant dense<0.000000e+00> : vector<8x8xf32>
      %160 = tpu.matmul %158, %159, %cst_63 {dimension_numbers = #tpu.dot_dimension_numbers<[1], [0], [0], [1], [0, 0, 1, 1], [], []>} : vector<8x8xbf16>, vector<8x8xbf16>, vector<8x8xf32> -> vector<8x8xf32>
      %161 = vector.extract_strided_slice %91 {offsets = [0, 24], sizes = [8, 8], strides = [1, 1]} : vector<8x96xf32> to vector<8x8xf32>
      %162 = vector.extract_strided_slice %91 {offsets = [0, 56], sizes = [8, 8], strides = [1, 1]} : vector<8x96xf32> to vector<8x8xf32>
      %163 = vector.extract_strided_slice %91 {offsets = [0, 88], sizes = [8, 8], strides = [1, 1]} : vector<8x96xf32> to vector<8x8xf32>
      %164 = arith.truncf %161 : vector<8x8xf32> to vector<8x8xbf16>
      %165 = arith.truncf %162 : vector<8x8xf32> to vector<8x8xbf16>
      %cst_64 = arith.constant dense<0.000000e+00> : vector<8x8xf32>
      %166 = tpu.matmul %164, %165, %cst_64 {dimension_numbers = #tpu.dot_dimension_numbers<[1], [1], [0], [0], [0, 0, 1, 0], [], []>} : vector<8x8xbf16>, vector<8x8xbf16>, vector<8x8xf32> -> vector<8x8xf32>
      %cst_65 = arith.constant 0.353553385 : f32
      %167 = vector.broadcast %cst_65 : f32 to vector<8x8xf32>
      %168 = arith.mulf %166, %167 : vector<8x8xf32>
      %169 = vector.broadcast %75 : vector<1x8xf32> to vector<8x8xf32>
      %170 = arith.addf %168, %169 : vector<8x8xf32>
      %cst_66 = arith.constant dense<0xFF800000> : vector<8xf32>
      %171 = vector.multi_reduction <maximumf>, %170, %cst_66 [1] : vector<8x8xf32> to vector<8xf32>
      %172 = vector.shape_cast %171 : vector<8xf32> to vector<8x1xf32>
      %173 = vector.broadcast %172 : vector<8x1xf32> to vector<8x8xf32>
      %174 = arith.subf %170, %173 : vector<8x8xf32>
      %175 = math.exp %174 : vector<8x8xf32>
      %cst_67 = arith.constant dense<0.000000e+00> : vector<8xf32>
      %176 = vector.multi_reduction <add>, %175, %cst_67 [1] : vector<8x8xf32> to vector<8xf32>
      %177 = vector.shape_cast %176 : vector<8xf32> to vector<8x1xf32>
      %178 = tpu.reciprocal %177 {approx = true} : vector<8x1xf32> -> vector<8x1xf32>
      %179 = vector.broadcast %178 : vector<8x1xf32> to vector<8x8xf32>
      %180 = arith.mulf %175, %179 : vector<8x8xf32>
      %181 = arith.truncf %180 : vector<8x8xf32> to vector<8x8xbf16>
      %182 = arith.truncf %163 : vector<8x8xf32> to vector<8x8xbf16>
      %cst_68 = arith.constant dense<0.000000e+00> : vector<8x8xf32>
      %183 = tpu.matmul %181, %182, %cst_68 {dimension_numbers = #tpu.dot_dimension_numbers<[1], [0], [0], [1], [0, 0, 1, 1], [], []>} : vector<8x8xbf16>, vector<8x8xbf16>, vector<8x8xf32> -> vector<8x8xf32>
      %184 = tpu.concatenate %114, %137, %160, %183 in 1 : vector<8x8xf32>, vector<8x8xf32>, vector<8x8xf32>, vector<8x8xf32> -> vector<8x32xf32>
      %c0_69 = arith.constant 0 : index
      %c0_70 = arith.constant 0 : index
      %185 = vector.load %arg9[%c0_69, %c0_70] : memref<32x32xf32, #tpu.memory_space<vmem>>, vector<32x32xf32>
      %186 = arith.truncf %184 : vector<8x32xf32> to vector<8x32xbf16>
      %187 = arith.truncf %185 : vector<32x32xf32> to vector<32x32xbf16>
      %cst_71 = arith.constant dense<0.000000e+00> : vector<8x32xf32>
      %188 = tpu.matmul %186, %187, %cst_71 {dimension_numbers = #tpu.dot_dimension_numbers<[1], [0], [0], [1], [0, 0, 1, 1], [], []>} : vector<8x32xbf16>, vector<32x32xbf16>, vector<8x32xf32> -> vector<8x32xf32>
      %189 = vector.broadcast %4 : vector<1x32xf32> to vector<8x32xf32>
      %190 = arith.addf %188, %189 : vector<8x32xf32>
      %191 = arith.addf %arg15, %190 : vector<8x32xf32>
      %cst_72 = arith.constant dense<0.000000e+00> : vector<8xf32>
      %192 = vector.multi_reduction <add>, %191, %cst_72 [1] : vector<8x32xf32> to vector<8xf32>
      %193 = vector.shape_cast %192 : vector<8xf32> to vector<8x1xf32>
      %cst_73 = arith.constant 3.200000e+01 : f32
      %194 = vector.broadcast %cst_73 : f32 to vector<8x1xf32>
      %195 = arith.divf %193, %194 : vector<8x1xf32>
      %196 = vector.broadcast %195 : vector<8x1xf32> to vector<8x32xf32>
      %197 = arith.subf %191, %196 : vector<8x32xf32>
      %198 = arith.mulf %197, %197 : vector<8x32xf32>
      %cst_74 = arith.constant dense<0.000000e+00> : vector<8xf32>
      %199 = vector.multi_reduction <add>, %198, %cst_74 [1] : vector<8x32xf32> to vector<8xf32>
      %200 = vector.shape_cast %199 : vector<8xf32> to vector<8x1xf32>
      %cst_75 = arith.constant 3.200000e+01 : f32
      %201 = vector.broadcast %cst_75 : f32 to vector<8x1xf32>
      %202 = arith.divf %200, %201 : vector<8x1xf32>
      %203 = vector.broadcast %195 : vector<8x1xf32> to vector<8x32xf32>
      %204 = arith.subf %191, %203 : vector<8x32xf32>
      %cst_76 = arith.constant 9.99999996E-13 : f32
      %205 = vector.broadcast %cst_76 : f32 to vector<8x1xf32>
      %206 = arith.addf %202, %205 : vector<8x1xf32>
      %207 = math.rsqrt %206 : vector<8x1xf32>
      %208 = vector.broadcast %207 : vector<8x1xf32> to vector<8x32xf32>
      %209 = arith.mulf %204, %208 : vector<8x32xf32>
      %210 = vector.broadcast %5 : vector<1x32xf32> to vector<8x32xf32>
      %211 = arith.mulf %209, %210 : vector<8x32xf32>
      %212 = vector.broadcast %6 : vector<1x32xf32> to vector<8x32xf32>
      %213 = arith.addf %211, %212 : vector<8x32xf32>
      %c0_77 = arith.constant 0 : index
      %c0_78 = arith.constant 0 : index
      %214 = vector.load %arg10[%c0_77, %c0_78] : memref<32x64xf32, #tpu.memory_space<vmem>>, vector<32x64xf32>
      %215 = arith.truncf %213 : vector<8x32xf32> to vector<8x32xbf16>
      %216 = arith.truncf %214 : vector<32x64xf32> to vector<32x64xbf16>
      %cst_79 = arith.constant dense<0.000000e+00> : vector<8x64xf32>
      %217 = tpu.matmul %215, %216, %cst_79 {dimension_numbers = #tpu.dot_dimension_numbers<[1], [0], [0], [1], [0, 0, 1, 1], [], []>} : vector<8x32xbf16>, vector<32x64xbf16>, vector<8x64xf32> -> vector<8x64xf32>
      %218 = vector.broadcast %7 : vector<1x64xf32> to vector<8x64xf32>
      %219 = arith.addf %217, %218 : vector<8x64xf32>
      %cst_80 = arith.constant 5.000000e-01 : f32
      %220 = vector.broadcast %cst_80 : f32 to vector<8x64xf32>
      %221 = arith.mulf %220, %219 : vector<8x64xf32>
      %cst_81 = arith.constant 4.471500e-02 : f32
      %222 = vector.broadcast %cst_81 : f32 to vector<8x64xf32>
      %223 = arith.mulf %222, %219 : vector<8x64xf32>
      %224 = arith.mulf %223, %219 : vector<8x64xf32>
      %225 = arith.mulf %224, %219 : vector<8x64xf32>
      %226 = arith.addf %219, %225 : vector<8x64xf32>
      %cst_82 = arith.constant 0.797884583 : f32
      %227 = vector.broadcast %cst_82 : f32 to vector<8x64xf32>
      %228 = arith.mulf %227, %226 : vector<8x64xf32>
      %229 = math.tanh %228 : vector<8x64xf32>
      %cst_83 = arith.constant 1.000000e+00 : f32
      %230 = vector.broadcast %cst_83 : f32 to vector<8x64xf32>
      %231 = arith.addf %230, %229 : vector<8x64xf32>
      %232 = arith.mulf %221, %231 : vector<8x64xf32>
      %c0_84 = arith.constant 0 : index
      %c0_85 = arith.constant 0 : index
      %233 = vector.load %arg11[%c0_84, %c0_85] : memref<64x32xf32, #tpu.memory_space<vmem>>, vector<64x32xf32>
      %234 = arith.truncf %232 : vector<8x64xf32> to vector<8x64xbf16>
      %235 = arith.truncf %233 : vector<64x32xf32> to vector<64x32xbf16>
      %cst_86 = arith.constant dense<0.000000e+00> : vector<8x32xf32>
      %236 = tpu.matmul %234, %235, %cst_86 {dimension_numbers = #tpu.dot_dimension_numbers<[1], [0], [0], [1], [0, 0, 1, 1], [], []>} : vector<8x64xbf16>, vector<64x32xbf16>, vector<8x32xf32> -> vector<8x32xf32>
      %237 = vector.broadcast %8 : vector<1x32xf32> to vector<8x32xf32>
      %238 = arith.addf %236, %237 : vector<8x32xf32>
      %239 = arith.addf %213, %238 : vector<8x32xf32>
      %cst_87 = arith.constant dense<0.000000e+00> : vector<8xf32>
      %240 = vector.multi_reduction <add>, %239, %cst_87 [1] : vector<8x32xf32> to vector<8xf32>
      %241 = vector.shape_cast %240 : vector<8xf32> to vector<8x1xf32>
      %cst_88 = arith.constant 3.200000e+01 : f32
      %242 = vector.broadcast %cst_88 : f32 to vector<8x1xf32>
      %243 = arith.divf %241, %242 : vector<8x1xf32>
      %244 = vector.broadcast %243 : vector<8x1xf32> to vector<8x32xf32>
      %245 = arith.subf %239, %244 : vector<8x32xf32>
      %246 = arith.mulf %245, %245 : vector<8x32xf32>
      %cst_89 = arith.constant dense<0.000000e+00> : vector<8xf32>
      %247 = vector.multi_reduction <add>, %246, %cst_89 [1] : vector<8x32xf32> to vector<8xf32>
      %248 = vector.shape_cast %247 : vector<8xf32> to vector<8x1xf32>
      %cst_90 = arith.constant 3.200000e+01 : f32
      %249 = vector.broadcast %cst_90 : f32 to vector<8x1xf32>
      %250 = arith.divf %248, %249 : vector<8x1xf32>
      %251 = vector.broadcast %243 : vector<8x1xf32> to vector<8x32xf32>
      %252 = arith.subf %239, %251 : vector<8x32xf32>
      %cst_91 = arith.constant 9.99999996E-13 : f32
      %253 = vector.broadcast %cst_91 : f32 to vector<8x1xf32>
      %254 = arith.addf %250, %253 : vector<8x1xf32>
      %255 = math.rsqrt %254 : vector<8x1xf32>
      %256 = vector.broadcast %255 : vector<8x1xf32> to vector<8x32xf32>
      %257 = arith.mulf %252, %256 : vector<8x32xf32>
      %258 = vector.broadcast %9 : vector<1x32xf32> to vector<8x32xf32>
      %259 = arith.mulf %257, %258 : vector<8x32xf32>
      %260 = vector.broadcast %10 : vector<1x32xf32> to vector<8x32xf32>
      %261 = arith.addf %259, %260 : vector<8x32xf32>
      scf.yield %261 : vector<8x32xf32>
    }
    %78 = vector.extract_strided_slice %77 {offsets = [0, 0], sizes = [1, 32], strides = [1, 1]} : vector<8x32xf32> to vector<1x32xf32>
    %79 = arith.mulf %78, %11 : vector<1x32xf32>
    %cst_42 = arith.constant dense<0.000000e+00> : vector<1xf32>
    %80 = vector.multi_reduction <add>, %79, %cst_42 [1] : vector<1x32xf32> to vector<1xf32>
    %81 = vector.shape_cast %80 : vector<1xf32> to vector<1x1xf32>
    %82 = arith.addf %81, %12 : vector<1x1xf32>
    %c0_43 = arith.constant 0 : index
    %c0_44 = arith.constant 0 : index
    %c0_45 = arith.constant 0 : index
    %83 = vector.load %arg13[%c0_43, %c0_44, %c0_45] : memref<1x1x1xf32, #tpu.memory_space<vmem>>, vector<1x1x1xf32>
    %84 = vector.shape_cast %83 : vector<1x1x1xf32> to vector<1x1xf32>
    %85 = vector.shape_cast %82 : vector<1x1xf32> to vector<1x1x1xf32>
    tpu.vector_store %arg13[%c0_43, %c0_44, %c0_45], %85 {strides = array<i32>} : memref<1x1x1xf32, #tpu.memory_space<vmem>>, vector<1x1x1xf32>,
    return
  }
  func.func @transform_0(%arg0: i32) -> (i32, i32, i32) {
    %c0_i32 = arith.constant 0 : i32
    %c0_i32_0 = arith.constant 0 : i32
    %c0_i32_1 = arith.constant 0 : i32
    return %arg0, %c0_i32, %c0_i32_0 : i32, i32, i32
  }
  func.func @transform_1(%arg0: i32) -> (i32, i32, i32) {
    %c0_i32 = arith.constant 0 : i32
    %c0_i32_0 = arith.constant 0 : i32
    %c0_i32_1 = arith.constant 0 : i32
    return %arg0, %c0_i32, %c0_i32_0 : i32, i32, i32
  }
  func.func @transform_2(%arg0: i32) -> (i32, i32, i32) {
    %c0_i32 = arith.constant 0 : i32
    %c0_i32_0 = arith.constant 0 : i32
    %c0_i32_1 = arith.constant 0 : i32
    return %arg0, %c0_i32, %c0_i32_0 : i32, i32, i32
  }
  func.func @transform_3(%arg0: i32) -> (i32, i32) {
    %c0_i32 = arith.constant 0 : i32
    %c0_i32_0 = arith.constant 0 : i32
    %c0_i32_1 = arith.constant 0 : i32
    return %c0_i32, %c0_i32_0 : i32, i32
  }
  func.func @transform_4(%arg0: i32) -> (i32, i32) {
    %c0_i32 = arith.constant 0 : i32
    %c0_i32_0 = arith.constant 0 : i32
    %c0_i32_1 = arith.constant 0 : i32
    return %c0_i32, %c0_i32_0 : i32, i32
  }
  func.func @transform_5(%arg0: i32) -> (i32, i32) {
    %c0_i32 = arith.constant 0 : i32
    %c0_i32_0 = arith.constant 0 : i32
    %c0_i32_1 = arith.constant 0 : i32
    return %c0_i32, %c0_i32_0 : i32, i32
  }
  func.func @transform_6(%arg0: i32) -> (i32, i32) {
    %c0_i32 = arith.constant 0 : i32
    %c0_i32_0 = arith.constant 0 : i32
    %c0_i32_1 = arith.constant 0 : i32
    return %c0_i32, %c0_i32_0 : i32, i32
  }
  func.func @transform_7(%arg0: i32) -> (i32, i32) {
    %c0_i32 = arith.constant 0 : i32
    %c0_i32_0 = arith.constant 0 : i32
    %c0_i32_1 = arith.constant 0 : i32
    return %c0_i32, %c0_i32_0 : i32, i32
  }
  func.func @transform_8(%arg0: i32) -> (i32, i32) {
    %c0_i32 = arith.constant 0 : i32
    %c0_i32_0 = arith.constant 0 : i32
    %c0_i32_1 = arith.constant 0 : i32
    return %c0_i32, %c0_i32_0 : i32, i32
  }
  func.func @transform_9(%arg0: i32) -> (i32, i32) {
    %c0_i32 = arith.constant 0 : i32
    %c0_i32_0 = arith.constant 0 : i32
    %c0_i32_1 = arith.constant 0 : i32
    return %c0_i32, %c0_i32_0 : i32, i32
  }
  func.func @transform_10(%arg0: i32) -> (i32, i32) {
    %c0_i32 = arith.constant 0 : i32
    %c0_i32_0 = arith.constant 0 : i32
    %c0_i32_1 = arith.constant 0 : i32
    return %c0_i32, %c0_i32_0 : i32, i32
  }
  func.func @transform_11(%arg0: i32) -> (i32, i32) {
    %c0_i32 = arith.constant 0 : i32
    %c0_i32_0 = arith.constant 0 : i32
    %c0_i32_1 = arith.constant 0 : i32
    return %c0_i32, %c0_i32_0 : i32, i32
  }
  func.func @transform_12(%arg0: i32) -> (i32, i32, i32) {
    %c0_i32 = arith.constant 0 : i32
    %c0_i32_0 = arith.constant 0 : i32
    %c0_i32_1 = arith.constant 0 : i32
    return %arg0, %c0_i32, %c0_i32_0 : i32, i32, i32
  }
}

</mosaic_0001>

<bundles_post_ra>
// kernel: direct_model_forward.1
= control target key start
LH: loop header
LB: loop body
LE: loop exit
PB: predicated region body
PF: predicated region fallthrough
CT: control target
= control target key end

     0   :  { %s1824_s21 = smov 0   ;;  %s2142_s0 = inlined_call_operand.vmem [shape: s32[2,8,1], index: 0, kind: input, shape index: {}]   ;;  %s2143_s1 = inlined_call_operand.vmem [shape: s32[2,8,1], index: 1, kind: input, shape index: {}]   ;;  %s2144_s2 = inlined_call_operand.vmem [shape: s32[2,1,8], index: 2, kind: input, shape index: {}]   ;;  %s2145_s3 = inlined_call_operand.vmem [shape: f32[64,16], index: 3, kind: input, shape index: {}]   ;;  %s2146_s4 = inlined_call_operand.vmem [shape: f32[16,16], index: 4, kind: input, shape index: {}]   ;;  %s2147_s5 = inlined_call_operand.vmem [shape: f32[2,16], index: 5, kind: input, shape index: {}]   ;;  %s2148_s6 = inlined_call_operand.vmem [shape: f32[16,32], index: 6, kind: input, shape index: {}]   ;;  %s2149_s7 = inlined_call_operand.vmem [shape: f32[32,96], index: 7, kind: input, shape index: {}]   ;;  %s2150_s8 = inlined_call_operand.vmem [shape: f32[32,32], index: 8, kind: input, shape index: {}]   ;;  %s2151_s9 = inlined_call_operand.vmem [shape: f32[32,64], index: 9, kind: input, shape index: {}]   ;;  %s2152_s10 = inlined_call_operand.vmem [shape: f32[64,32], index: 10, kind: input, shape index: {}]   ;;  %s2153_s11 = inlined_call_operand.vmem [shape: f32[13,128], index: 11, kind: input, shape index: {}]   ;;  %s2154_s12 = inlined_call_operand.vmem [shape: f32[2,1,1], index: 12, kind: output, shape index: {}]  }
   0x1 LB: > { %s1469_s22 = sadd.s32 4294967295, %s1729_s21   ;;  %p1473_p0 = scmp.ge.s32.totalorder %s1729_s21, 1  ;;  %s1729_s21 = sphi %s1824_s21, %s22_s21  }
   0x2   : > { %p378_p1 = scmp.lt.s32.totalorder %s1729_s21, 3 }
   0x4   : > { %p379_p2 = pnand %p1473_p0, %p378_p1 }
   0x5   : > { %p424_p3 = scmp.lt.s32.totalorder (!%p379_p2), %s1469_s22, 1  ;;  %v1835_v0 = vld [vmem:[%s2153_s11 + $0x3] ss:$0 sm:$0xff] (!%p379_p2)  ;;  %v1739_v1 = vmov (!%p379_p2), 0   ;;  %v1840_v2 = vld [vmem:[%s2153_s11 + $0x4] ss:$0 sm:$0xff] (!%p379_p2)  ;;  %v455_v31 = vlaneseq (!%p379_p2) }
   0x6   : > { %382 = sbr.rel (%p379_p2) target bundleno = 3617 (0xe21), region = 68  ;;  %1689 = vset.pattern.permute.xlu0 (!%p379_p2), %v1739_v1  ;;  %1690 = vset.pattern.permute.xlu1 (!%p379_p2), %v1739_v1  ;;  %v1845_v3 = vld [vmem:[%s2153_s11 + $0x5] ss:$0 sm:$0xff] (!%p379_p2)  ;;  %v1850_v4 = vld [vmem:[%s2153_s11 + $0x6] ss:$0 sm:$0xff] (!%p379_p2)  ;;  %v1740_v10 = vmov (!%p379_p2), 0.0  }
   0x7   : > { %v1857_v5 = vld [vmem:[%s2153_s11 + $0x7] ss:$0 sm:$0xff] (!%p379_p2)  ;;  %v1862_v6 = vld [vmem:[%s2153_s11 + $0x8] ss:$0 sm:$0xff] (!%p379_p2)  ;;  %v1867_v7 = vld [vmem:[%s2153_s11 + $0x9] ss:$0 sm:$0xff] (!%p379_p2)  ;;  %1543 = vmatprep.subr.bf16.mxu0 (!%p379_p2), %v1740_v10  ;;  %1555 = vmatprep.subr.bf16.mxu1 (!%p379_p2), %v1740_v10 }
   0x8   : > { %v1872_v8 = vld [vmem:[%s2153_s11 + $0xa] ss:$0 sm:$0xff] (!%p379_p2)  ;;  %v1877_v9 = vld [vmem:[%s2153_s11 + $0xb] sm:$0x1] (!%p379_p2)  ;;  %v1887_v11 = vld [vmem:[%s2153_s11 + $0xc] sm:$0x1] (!%p379_p2) }
   0x9   : > { %v461_v12 = vld [vmem:[%s2145_s3] sm:$0xff] (!%p379_p2)  ;;  %v462_v13 = vld [vmem:[%s2145_s3 + $0x8] sm:$0xff] (!%p379_p2)  ;;  %v463_v16 = vld [vmem:[%s2145_s3 + $0x10] sm:$0xff] (!%p379_p2)  ;;  %v1741_v19 = vmov (!%p379_p2), -1e+09   ;;  %vm1742_vm1 = vmmov (!%p379_p2), 0  }
   0xa   : > { %v472_v15 = vpack.c.bf16 (!%p379_p2), %v462_v13, %v461_v12  ;;  %v464_v17 = vld [vmem:[%s2145_s3 + $0x18] sm:$0xff] (!%p379_p2)  ;;  %v465_v24 = vld [vmem:[%s2145_s3 + $0x20] sm:$0xff] (!%p379_p2)  ;;  %v466_v25 = vld [vmem:[%s2145_s3 + $0x28] sm:$0xff] (!%p379_p2)  ;;  %1551 = vmatprep.mubr.msk.bf16.mxu0 (!%p379_p2), %vm1742_vm1, %v1740_v10  ;;  %1557 = vmatprep.mubr.msk.bf16.mxu1 (!%p379_p2), %vm1742_vm1, %v1740_v10  ;;  %v456_v32 = vand.u32 (!%p379_p2), 127, %v455_v31  ;;  %vm501_vm3 = vcmask (!%p379_p2), 523264   ;;  %vm546_vm4 = vcmask (!%p379_p2), 130048  }
   0xb   : > { %v473_v22 = vpack.c.bf16 (!%p379_p2), %v464_v17, %v463_v16  ;;  %v474_v27 = vpack.c.bf16 (!%p379_p2), %v466_v25, %v465_v24  ;;  %v467_v28 = vld [vmem:[%s2145_s3 + $0x30] sm:$0xff] (!%p379_p2)  ;;  %v468_v29 = vld [vmem:[%s2145_s3 + $0x38] sm:$0xff] (!%p379_p2)  ;;  %v1478_v36 = vld [vmem:[%s2147_s5 + $0x1] ss:$0 sm:$0xff] (!%p379_p2)  ;;  %s1956_s27 = smov (!%p379_p2), 0  }
   0xc   : > { %1544 = vmatpush3.bf16.msra.mxu0 (!%p379_p2), %v472_v15  ;;  %v475_v30 = vpack.c.bf16 (!%p379_p2), %v468_v29, %v467_v28  ;;  %v1477_v38 = vld [vmem:[%s2147_s5] ss:$0 sm:$0xff] (!%p379_p2)  ;;  %v572_v57 = vld [vmem:[%s2148_s6 + $0x8] sm:$0xff] (!%p379_p2)  ;;  %v1482_v15 = vld [vmem:[%s2153_s11 + $0x2] ss:$0 sm:$0xff] (!%p379_p2) }
   0xd   : > { %s2157_s22 = smov (!%p424_p3, %s1469_s22), 1  ;;  %1545 = vmatprep.subr.bf16.mxu0 %v1740_v10  ;;  %v500_v42 = vld [vmem:[%s2146_s4] sm:$0xff] }
   0xe   : > { %s1474_s25 = sshll.u32 %s2157_s22, 3  ;;  %s434_s28 = scalar_lea.vmem %s2144_s2, %s2157_s22  ;;  %v571_v56 = vld [vmem:[%s2148_s6] sm:$0xff] }
   0xf   : > { %s427_s19 = scalar_lea.vmem %s2142_s0, %s1474_s25  ;;  %s437_s24 = scalar_lea.vmem %s2154_s12, %s2157_s22  ;;  %v622_v14 = vld [vmem:[%s434_s28] sm:$0x1]  ;;  %v574_v58 = vpack.c.bf16 %v572_v57, %v571_v56 }
  0x10   : > { %v452_v18 = vld [vmem:[%s427_s19] sm:$0xff]  ;;  %vm623_vm0 = vcmp.gt.s32.totalorder %v622_v14, 0  ;;  %s431_s15 = scalar_lea.vmem %s2143_s1, %s1474_s25  ;;  %1546 = vmatpush3.bf16.msra.mxu0 %v473_v22 }
  0x11   : > { %v1911_v20 = vsel %vm623_vm0, 0.0, %v1741_v19  ;;  %458 = vperm.xlu0 %1689, %v452_v18   ;;  %v453_v21 = vld [vmem:[%s431_s15] sm:$0xff]  ;;  %1547 = vmatprep.subr.bf16.mxu0 %v1740_v10 }
  0x12   : > { %v454_v23 = vcvt.s32.f32 %v453_v21  ;;  %1556 = vmatpush3.bf16.msra.mxu1 %v574_v58  ;;  %v1480_v63 = vld [vmem:[%s2153_s11] ss:$0 sm:$0xff] }
  0x14   : > { %495 = vperm.xlu1 %1690, %v454_v23   ;;  %v477_v26 = vsub.f32 1.0, %v454_v23  ;;  %1548 = vmatpush3.bf16.msra.mxu0 %v474_v27 }
  0x15   : > { %1549 = vmatprep.subr.bf16.mxu0 %v1740_v10 }
  0x16   : > { %484 = vperm.xlu0 %1689, %v477_v26  }
  0x18   : > { %1550 = vmatpush3.bf16.msra.mxu0 %v475_v30 }
  0x90   : > { %v459_v33 = vpop.permute.xlu0 %458 }
  0x91   : > { %vm460_vm2 = vcmp.eq.s32.totalorder %v456_v32, %v459_v33 }
  0x92   : > { %v1476_v34 = vsel %vm460_vm2, 1.0, %v1740_v10  ;;  %v1481_v10 = vld [vmem:[%s2153_s11 + $0x1] ss:$0 sm:$0xff] }
  0x93   : > { %v471_v35 = vpack.c.bf16 %v1476_v34, %v1476_v34  ;;  %v496_v37 = vpop.permute.xlu1 %495 }
  0x94   : > { %v498_v40 = vmul.f32 %v1478_v36, %v496_v37 }
  0x95   : > { %1552 = vmatmul.mubr.msk.bf16.vlgmr.msra.gmra.mrb[0].mxu0 %vm501_vm3, %v471_v35  ;;  %v485_v39 = vpop.permute.xlu0 %484 }
  0x96   : > { %v487_v41 = vmul.f32 %v1477_v38, %v485_v39 }
  0x98   : > { %v499_v44 = vadd.f32 %v498_v40, %v487_v41 }
 0x168   : > { %v539_v43 = vpop.f32.mrb[0].mxu0 }
 0x169   : > { %v540_v45 = vadd.f32 %v539_v43, %v500_v42  ;;  %v1553_v46 = vpop.f32.mrb[1].mxu0 }
 0x16a   : > { %v542_v47 = vpop.f32.mrb[2].mxu0 }
 0x16b   : > { %v1554_v48 = vpop.f32.mrb[3].mxu0  ;;  %v545_v49 = vadd.f32 %v540_v45, %v499_v44 }
 0x16d   : > { %v547_v50 = vsel %vm546_vm4, %v545_v49, 0.0 }
 0x16e   : > { %548 = vadd.xlane.f32.xlu1 %v547_v50 }
 0x1fb   : > { %v549_v51 = vpop.xlane.xlu1 %548 }
 0x1fc   : > { %v551_v52 = vmul.f32 0.0625, %v549_v51 }
 0x1fe   : > { %v552_v53 = vsub.f32 %v545_v49, %v551_v52 }
 0x200   : > { %v553_v54 = vmul.f32 %v552_v53, %v552_v53 }
 0x202   : > { %v554_v55 = vsel %vm546_vm4, %v553_v54, 0.0 }
 0x203   : > { %555 = vadd.xlane.f32.xlu0 %v554_v55 }
 0x290   : > { %v556_v59 = vpop.xlane.xlu0 %555 }
 0x291   : > { %v557_v60 = vmul.f32 0.0625, %v556_v59 }
 0x293   : > { %v558_v61 = vadd.f32 1e-12, %v557_v60 }
 0x295   : > { %1691 = vrsqrt.f32 %v558_v61 }
 0x29f   : > { %v1692_v62 = vpop.eup %1691 }
 0x2a0   : > { %v560_v1 = vmul.f32 %v1692_v62, %v552_v53 }
 0x2a2   : > { %v565_v12 = vmul.f32 %v1480_v63, %v560_v1 }
 0x2a4   : > { %v570_v13 = vadd.f32 %v1481_v10, %v565_v12 }
 0x2a6   : > { %v573_v14 = vpack.c.bf16 %v570_v13, %v570_v13 }
 0x2a8   : > { %1558 = vmatmul.mubr.msk.bf16.vlgmr.msra.gmra.mrb[0].mxu1 %vm546_vm4, %v573_v14 }
 0x37b   : > { %v616_v16 = vpop.f32.mrb[0].mxu1 }
 0x37c   : > { %v617_v17 = vadd.f32 %v1482_v15, %v616_v16   ;;  %v1559_v18 = vpop.f32.mrb[1].mxu1 }
 0x37d   : > { %v619_v19 = vpop.f32.mrb[2].mxu1 }
 0x37e   : > { %v1560_v21 = vpop.f32.mrb[3].mxu1 }
 0x37f LB: >> { %v632_v22 = vld [vmem:[%s2149_s7] sm:$0xff]  ;;  %v633_v23 = vld [vmem:[%s2149_s7 + $0x8] sm:$0xff]  ;;  %v634_v24 = vld [vmem:[%s2149_s7 + $0x10] sm:$0xff]  ;;  %v1743_v25 = vmov 0.0   ;;  %vm1744_vm5 = vmmov 0   ;;  %v636_v29 = vpack.c.bf16 %v1733_v17, %v1733_v17  ;;  %vm643_vm6 = vcmask 261120   ;;  %s1737_s27 = sphi %s1956_s27, %s630_s27   ;;  %v1733_v17 = vphi %v617_v17, %v2155_v17  }
 0x380   : >> { %1561 = vmatprep.subr.bf16.mxu0 %v1743_v25  ;;  %v637_v26 = vpack.c.bf16 %v633_v23, %v632_v22  ;;  %v635_v27 = vld [vmem:[%s2149_s7 + $0x18] sm:$0xff]  ;;  %1565 = vmatprep.mubr.msk.bf16.mxu0 %vm1744_vm5, %v1743_v25  ;;  %s1745_s18 = smov 120   ;;  %s1746_s25 = smov 96   ;;  %vm691_vm7 = vcmask 64512   ;;  %v741_v48 = vshrl.u32 %v455_v31, 7  ;;  %vm763_vm8 = vcmask 1043456  }
 0x381   : >> { %1569 = vmatprep.subr.bf16.mxu1 %v1743_v25  ;;  %1571 = vmatprep.mubr.msk.bf16.mxu1 %vm1744_vm5, %v1743_v25  ;;  %v638_v28 = vpack.c.bf16 %v635_v27, %v634_v24  ;;  %s1747_s19 = smov 80   ;;  %s1748_s20 = smov 88   ;;  %vm1157_vm9 = vcmask 195584  }
 0x382   : >> { %1562 = vmatpush3.bf16.msra.mxu0 %v637_v26  ;;  %s1749_s23 = smov 72   ;;  %s1750_s26 = smov 112   ;;  %v742_v49 = vsub.s32 0, %v741_v48 }
 0x383   : >> { %1563 = vmatprep.subr.bf16.mxu0 %v1743_v25  ;;  %s1751_s29 = smov 104   ;;  %s1752_s30 = smov 56  }
 0x384   : >> { %v743_v50 = vrot.slane %v1911_v20, %v742_v49  ;;  %s1753_s13 = smov 64   ;;  %s1754_s14 = smov 40  }
 0x385   : >> { %s1755_s15 = smov 48   ;;  %s1756_s28 = smov 8  }
 0x386   : >> { %1564 = vmatpush3.bf16.msra.mxu0 %v638_v28  ;;  %s630_s27 = sadd.s32 1, %s1737_s27  }
 0x387   : >> { %1575 = vmatprep.subr.bf16.mxu0 %v1743_v25  ;;  %p627_p4 = scmp.ge.s32.totalorder %s630_s27, 2  }
 0x388   : > { %vm1386_vm10 = vcmask (%p627_p4), 253952   ;;  %vm1391_vm11 = vcmask (%p627_p4), 0  }
 0x389   : >> { %1566 = vmatmul.mubr.msk.bf16.vlgmr.msra.gmra.mrb[0].mxu0 %vm643_vm6, %v636_v29 }
 0x38a   : >> { %1577 = vmatprep.mubr.msk.bf16.mxu0 %vm1744_vm5, %v1743_v25 }
 0x45c   : >> { %v681_v30 = vpop.f32.mrb[0].mxu0 }
 0x45d   : >> { %v682_v32 = vadd.f32 %v1835_v0, %v681_v30  ;;  %v1567_v33 = vpop.f32.mrb[1].mxu0 }
 0x45e   : >> { %v684_v34 = vpop.f32.mrb[2].mxu0 }
 0x45f   : >> { %v1990_v35 = vpack.c.bf16 %v682_v32, %v682_v32  ;;  %v1568_v36 = vpop.f32.mrb[3].mxu0 }
 0x461   : >> { %807 = vrot.lane.b32.xlu1 %v1990_v35, %s1745_s18  ;;  %689 = vrot.lane.b32.xlu0 %v1990_v35, %s1746_s25 }
 0x465   : >> { %921 = vrot.lane.b32.xlu1 %v1990_v35, %s1747_s19  ;;  %809 = vrot.lane.b32.xlu0 %v1990_v35, %s1748_s20 }
 0x469   : >> { %1033 = vrot.lane.b32.xlu1 %v1990_v35, %s1749_s23  ;;  %919 = vrot.lane.b32.xlu0 %v1990_v35, %s1750_s26 }
 0x46d   : >> { %1031 = vrot.lane.b32.xlu0 %v1990_v35, %s1751_s29  ;;  %s1757_s29 = smov 16  }
 0x4d3   : >> { %v690_v37 = vpop.permute.xlu0 %689  ;;  %v808_v40 = vpop.permute.xlu1 %807 }
 0x4d4   : >> { %v696_v38 = vsel %vm691_vm7, %v690_v37, 0 }
 0x4d5   : >> { %1570 = vmatpush3.bf16.xpose.msra.mxu1 %v696_v38 }
 0x4d6   : >> { %1581 = vmatprep.subr.bf16.mxu1 %v1743_v25 }
 0x4d7   : >> { %v810_v39 = vpop.permute.xlu0 %809  ;;  %v922_v42 = vpop.permute.xlu1 %921 }
 0x4d8   : >> { %v815_v41 = vsel %vm691_vm7, %v810_v39, 0  ;;  %v927_v43 = vsel %vm691_vm7, %v922_v42, 0 }
 0x4db   : >> { %v1034_v44 = vpop.permute.xlu1 %1033  ;;  %v920_v45 = vpop.permute.xlu0 %919 }
 0x4dc   : >> { %1572 = vmatmul.mubr.msk.bf16.vlgmr.msra.gmra.mrb[0].mxu1 %vm691_vm7, %v1990_v35  ;;  %v1039_v46 = vsel %vm691_vm7, %v1034_v44, 0 }
 0x4dd   : >> { %1582 = vmatpush3.bf16.xpose.msra.mxu1 %v815_v41  ;;  %1583 = vmatprep.mubr.msk.bf16.mxu1 %vm1744_vm5, %v1743_v25 }
 0x4de   : >> { %1593 = vmatprep.subr.bf16.mxu1 %v1743_v25 }
 0x4df   : >> { %v1032_v47 = vpop.permute.xlu0 %1031 }
 0x4e4   : >> { %1584 = vmatmul.mubr.msk.bf16.vlgmr.msra.gmra.mrb[4].mxu1 %vm691_vm7, %v808_v40 }
 0x4e5   : >> { %1594 = vmatpush3.bf16.xpose.msra.mxu1 %v927_v43  ;;  %1595 = vmatprep.mubr.msk.bf16.mxu1 %vm1744_vm5, %v1743_v25 }
 0x4e6   : >> { %1605 = vmatprep.subr.bf16.mxu1 %v1743_v25 }
 0x4ec   : >> { %1596 = vmatmul.mubr.msk.bf16.vlgmr.msra.gmra.mrb[8].mxu1 %vm691_vm7, %v920_v45 }
 0x4ed   : >> { %1606 = vmatpush3.bf16.xpose.msra.mxu1 %v1039_v46  ;;  %1607 = vmatprep.mubr.msk.bf16.mxu1 %vm1744_vm5, %v1743_v25 }
 0x4ee   : >> { %1617 = vmatprep.subr.bf16.mxu1 %v1743_v25 }
 0x4f4   : >> { %1608 = vmatmul.mubr.msk.bf16.vlgmr.msra.gmra.mrb[12].mxu1 %vm691_vm7, %v1032_v47 }
 0x4f5   : >> { %1621 = vmatprep.mubr.msk.bf16.mxu1 %vm1744_vm5, %v1743_v25 }
 0x5af   : >> { %v732_v51 = vpop.f32.mrb[0].mxu1 }
 0x5b0   : >> { %v738_v52 = vmul.f32 0.35355338, %v732_v51  ;;  %v1573_v53 = vpop.f32.mrb[1].mxu1 }
 0x5b1   : >> { %v735_v54 = vpop.f32.mrb[2].mxu1 }
 0x5b2   : >> { %v1574_v55 = vpop.f32.mrb[3].mxu1  ;;  %v745_v56 = vadd.f32 %v743_v50, %v738_v52 }
 0x5b4   : >> { %v746_v57 = vsel %vm691_vm7, %v745_v56, -inf }
 0x5b5   : >> { %747 = vmax.xlane.f32.xlu1 %v746_v57 }
 0x5b7   : >> { %v851_v58 = vpop.f32.mrb[4].mxu1 }
 0x5b8   : >> { %v857_v59 = vmul.f32 0.35355338, %v851_v58  ;;  %v1585_v60 = vpop.f32.mrb[5].mxu1 }
 0x5b9   : >> { %v854_v61 = vpop.f32.mrb[6].mxu1 }
 0x5ba   : >> { %v1586_v62 = vpop.f32.mrb[7].mxu1  ;;  %v858_v63 = vadd.f32 %v857_v59, %v743_v50 }
 0x5bc   : >> { %v859_v1 = vsel %vm691_vm7, %v858_v63, -inf }
 0x5bd   : >> { %860 = vmax.xlane.f32.xlu0 %v859_v1 }
 0x5bf   : >> { %v963_v10 = vpop.f32.mrb[8].mxu1 }
 0x5c0   : >> { %v969_v12 = vmul.f32 0.35355338, %v963_v10  ;;  %v1597_v13 = vpop.f32.mrb[9].mxu1 }
 0x5c1   : >> { %v966_v14 = vpop.f32.mrb[10].mxu1 }
 0x5c2   : >> { %v1598_v15 = vpop.f32.mrb[11].mxu1  ;;  %v970_v16 = vadd.f32 %v969_v12, %v743_v50 }
 0x5c4   : >> { %v971_v18 = vsel %vm691_vm7, %v970_v16, -inf }
 0x5c5   : >> { %972 = vmax.xlane.f32.xlu0 %v971_v18 }
 0x5c7   : >> { %v1075_v19 = vpop.f32.mrb[12].mxu1 }
 0x5c8   : >> { %v1081_v21 = vmul.f32 0.35355338, %v1075_v19  ;;  %v1609_v22 = vpop.f32.mrb[13].mxu1 }
 0x5c9   : >> { %v1078_v23 = vpop.f32.mrb[14].mxu1 }
 0x5ca   : >> { %v1610_v24 = vpop.f32.mrb[15].mxu1  ;;  %v1082_v26 = vadd.f32 %v1081_v21, %v743_v50 }
 0x5cc   : >> { %v1083_v27 = vsel %vm691_vm7, %v1082_v26, -inf }
 0x5cd   : >> { %1084 = vmax.xlane.f32.xlu1 %v1083_v27 }
 0x642   : >> { %v748_v28 = vpop.xlane.xlu1 %747 }
 0x643   : >> { %v749_v29 = vsub.f32 %v745_v56, %v748_v28 }
 0x645   : >> { %v750_v30 = vmul.f32 1.442695, %v749_v29 }
 0x647   : >> { %1693 = vpow2.f32 %v750_v30  ;;  %v1159_v30 = vld [vmem:[%s2150_s8] sm:$0xff] }
 0x64a   : >> { %v861_v32 = vpop.xlane.xlu0 %860 }
 0x64b   : >> { %v862_v33 = vsub.f32 %v858_v63, %v861_v32  ;;  %v1160_v32 = vld [vmem:[%s2150_s8 + $0x8] sm:$0xff] }
 0x64d   : >> { %v863_v34 = vmul.f32 1.442695, %v862_v33  ;;  %v1164_v33 = vpack.c.bf16 %v1160_v32, %v1159_v30  ;;  %v1304_v30 = vld [vmem:[%s2152_s10 + $0x18] sm:$0xff] }
 0x64f   : >> { %1695 = vpow2.f32 %v863_v34  ;;  %1618 = vmatpush3.bf16.msra.mxu1 %v1164_v33  ;;  %v1161_v34 = vld [vmem:[%s2150_s8 + $0x10] sm:$0xff]  ;;  %v1305_v33 = vld [vmem:[%s2152_s10 + $0x20] sm:$0xff] }
 0x650   : >> { %1619 = vmatprep.subr.bf16.mxu1 %v1743_v25 }
 0x651   : >> { %v1694_v36 = vpop.eup %1693 }
 0x652   : >> { %v973_v37 = vpop.xlane.xlu0 %972  ;;  %v752_v38 = vsel %vm691_vm7, %v1694_v36, 0.0 }
 0x653   : >> { %v974_v39 = vsub.f32 %v970_v16, %v973_v37  ;;  %753 = vadd.xlane.f32.xlu0 %v752_v38 }
 0x655   : >> { %v975_v40 = vmul.f32 1.442695, %v974_v39 }
 0x657   : >> { %1697 = vpow2.f32 %v975_v40 }
 0x659   : >> { %v1696_v41 = vpop.eup %1695 }
 0x65a   : >> { %v865_v42 = vsel %vm691_vm7, %v1696_v41, 0.0  ;;  %v1085_v45 = vpop.xlane.xlu1 %1084 }
 0x65b   : >> { %866 = vadd.xlane.f32.xlu1 %v865_v42  ;;  %v1086_v46 = vsub.f32 %v1082_v26, %v1085_v45 }
 0x65d   : >> { %v1087_v47 = vmul.f32 1.442695, %v1086_v46 }
 0x65f   : >> { %1699 = vpow2.f32 %v1087_v47 }
 0x661   : >> { %v1698_v43 = vpop.eup %1697 }
 0x662   : >> { %v977_v44 = vsel %vm691_vm7, %v1698_v43, 0.0 }
 0x663   : >> { %978 = vadd.xlane.f32.xlu0 %v977_v44 }
 0x669   : >> { %v1700_v48 = vpop.eup %1699 }
 0x66a   : >> { %v1089_v49 = vsel %vm691_vm7, %v1700_v48, 0.0 }
 0x66c   : >> { %871 = vrot.lane.b32.xlu1 %v1990_v35, %s1752_s30  ;;  %s1758_s30 = smov 24  }
 0x679   : >> { %758 = vrot.lane.b32.xlu0 %v1990_v35, %s1753_s13 }
 0x67d   : >> { %1095 = vrot.lane.b32.xlu0 %v1990_v35, %s1754_s14 }
 0x690   : >> { %1090 = vadd.xlane.f32.xlu1 %v1089_v49 }
 0x6a1   : >> { %983 = vrot.lane.b32.xlu1 %v1990_v35, %s1755_s15 }
 0x6e0   : >> { %v754_v50 = vpop.xlane.xlu0 %753 }
 0x6e1   : >> { %1701 = vrcp.f32 %v754_v50 }
 0x6e8   : >> { %v867_v51 = vpop.xlane.xlu1 %866 }
 0x6e9   : >> { %1703 = vrcp.f32 %v867_v51 }
 0x6eb   : >> { %v1702_v52 = vpop.eup %1701 }
 0x6ec   : >> { %v756_v54 = vmul.f32 %v1702_v52, %v1694_v36  ;;  %v872_v57 = vpop.permute.xlu1 %871  ;;  %v1162_v36 = vld [vmem:[%s2150_s8 + $0x18] sm:$0xff] }
 0x6ed   : >> { %v877_v60 = vsel %vm763_vm8, %v872_v57, 0  ;;  %v1165_v37 = vpack.c.bf16 %v1162_v36, %v1161_v34  ;;  %v1306_v34 = vld [vmem:[%s2152_s10 + $0x28] sm:$0xff] }
 0x6ee   : >> { %v757_v58 = vpack.c.bf16 %v756_v54, %v756_v54  ;;  %v1312_v36 = vpack.c.bf16 %v1306_v34, %v1305_v33 }
 0x6ef   : >> { %1620 = vmatpush3.bf16.msra.mxu1 %v1165_v37  ;;  %v1307_v37 = vld [vmem:[%s2152_s10 + $0x30] sm:$0xff] }
 0x6f0   : >> { %v979_v53 = vpop.xlane.xlu0 %978  ;;  %1633 = vmatprep.subr.bf16.mxu1 %v1743_v25 }
 0x6f1   : >> { %1705 = vrcp.f32 %v979_v53 }
 0x6f3   : >> { %v1704_v59 = vpop.eup %1703 }
 0x6f4   : >> { %v759_v55 = vpop.permute.xlu0 %758  ;;  %v869_v35 = vmul.f32 %v1704_v59, %v1696_v41 }
 0x6f5   : >> { %v765_v56 = vsel %vm763_vm8, %v759_v55, 0 }
 0x6f6   : >> { %1576 = vmatpush3.bf16.msra.mxu0 %v765_v56  ;;  %v870_v61 = vpack.c.bf16 %v869_v35, %v869_v35 }
 0x6f7   : >> { %1587 = vmatprep.subr.bf16.mxu0 %v1743_v25 }
 0x6f8   : >> { %v1096_v13 = vpop.permute.xlu0 %1095 }
 0x6f9   : >> { %1578 = vmatmul.mubr.msk.bf16.vlgmr.msra.gmra.mrb[4].mxu0 %vm691_vm7, %v757_v58  ;;  %v1101_v15 = vsel %vm763_vm8, %v1096_v13, 0  ;;  %v1241_v13 = vld [vmem:[%s2151_s9 + $0x18] sm:$0xff] }
 0x6fa   : >> { %1588 = vmatpush3.bf16.msra.mxu0 %v877_v60  ;;  %1589 = vmatprep.mubr.msk.bf16.mxu0 %vm1744_vm5, %v1743_v25 }
 0x6fb   : >> { %1599 = vmatprep.subr.bf16.mxu0 %v1743_v25  ;;  %v1706_v62 = vpop.eup %1705 }
 0x6fc   : >> { %v981_v1 = vmul.f32 %v1706_v62, %v1698_v43 }
 0x6fe   : >> { %v982_v14 = vpack.c.bf16 %v981_v1, %v981_v1  ;;  %v1238_v1 = vld [vmem:[%s2151_s9] sm:$0xff] }
 0x701   : >> { %1590 = vmatmul.mubr.msk.bf16.vlgmr.msra.gmra.mrb[8].mxu0 %vm691_vm7, %v870_v61 }
 0x702   : >> { %1601 = vmatprep.mubr.msk.bf16.mxu0 %vm1744_vm5, %v1743_v25 }
 0x71d   : >> { %v1091_v63 = vpop.xlane.xlu1 %1090 }
 0x71e   : >> { %1707 = vrcp.f32 %v1091_v63 }
 0x721   : >> { %v984_v10 = vpop.permute.xlu1 %983 }
 0x722   : >> { %v989_v12 = vsel %vm763_vm8, %v984_v10, 0  ;;  %v1239_v10 = vld [vmem:[%s2151_s9 + $0x8] sm:$0xff] }
 0x723   : >> { %1600 = vmatpush3.bf16.msra.mxu0 %v989_v12  ;;  %v1243_v12 = vpack.c.bf16 %v1239_v10, %v1238_v1 }
 0x724   : >> { %1611 = vmatprep.subr.bf16.mxu0 %v1743_v25 }
 0x726   : >> { %1602 = vmatmul.mubr.msk.bf16.vlgmr.msra.gmra.mrb[12].mxu0 %vm691_vm7, %v982_v14 }
 0x727   : >> { %1612 = vmatpush3.bf16.msra.mxu0 %v1101_v15  ;;  %1613 = vmatprep.mubr.msk.bf16.mxu0 %vm1744_vm5, %v1743_v25 }
 0x728   : >> { %v1708_v16 = vpop.eup %1707  ;;  %1625 = vmatprep.subr.bf16.mxu0 %v1743_v25 }
 0x729   : >> { %v1093_v18 = vmul.f32 %v1708_v16, %v1700_v48 }
 0x72b   : >> { %v1094_v19 = vpack.c.bf16 %v1093_v18, %v1093_v18 }
 0x72e   : >> { %1614 = vmatmul.mubr.msk.bf16.vlgmr.msra.gmra.mrb[16].mxu0 %vm691_vm7, %v1094_v19 }
 0x72f   : >> { %1629 = vmatprep.mubr.msk.bf16.mxu0 %vm1744_vm5, %v1743_v25  ;;  %1626 = vmatpush3.bf16.msra.mxu0 %v1243_v12 }
 0x730   : >> { %1627 = vmatprep.subr.bf16.mxu0 %v1743_v25 }
 0x7cc   : >> { %v801_v21 = vpop.f32.mrb[4].mxu0 }
 0x7cd   : >> { %v1579_v22 = vpop.f32.mrb[5].mxu0 }
 0x7ce   : >> { %v804_v23 = vpop.f32.mrb[6].mxu0 }
 0x7cf   : >> { %v1580_v24 = vpop.f32.mrb[7].mxu0 }
 0x7d4   : >> { %v913_v26 = vpop.f32.mrb[8].mxu0 }
 0x7d5   : >> { %1144 = vrot.lane.b32.xlu1 %v913_v26, %s1756_s28  ;;  %v1591_v27 = vpop.f32.mrb[9].mxu0  ;;  %v1301_v26 = vld [vmem:[%s2152_s10] sm:$0xff] }
 0x7d6   : >> { %v916_v28 = vpop.f32.mrb[10].mxu0  ;;  %v1302_v27 = vld [vmem:[%s2152_s10 + $0x8] sm:$0xff] }
 0x7d7   : >> { %v1592_v29 = vpop.f32.mrb[11].mxu0  ;;  %v1303_v28 = vld [vmem:[%s2152_s10 + $0x10] sm:$0xff] }
 0x7d8   : >> { %v1310_v29 = vpack.c.bf16 %v1302_v27, %v1301_v26  ;;  %v1311_v32 = vpack.c.bf16 %v1304_v30, %v1303_v28 }
 0x7f9   : >> { %v1025_v38 = vpop.f32.mrb[12].mxu0 }
 0x7fa   : >> { %1148 = vrot.lane.b32.xlu0 %v1025_v38, %s1757_s29  ;;  %v1603_v39 = vpop.f32.mrb[13].mxu0  ;;  %v1308_v38 = vld [vmem:[%s2152_s10 + $0x38] sm:$0xff] }
 0x7fb   : >> { %v1028_v40 = vpop.f32.mrb[14].mxu0  ;;  %v1313_v39 = vpack.c.bf16 %v1308_v38, %v1307_v37 }
 0x7fc   : >> { %v1604_v41 = vpop.f32.mrb[15].mxu0 }
 0x801   : >> { %v1137_v42 = vpop.f32.mrb[16].mxu0 }
 0x802   : >> { %1152 = vrot.lane.b32.xlu1 %v1137_v42, %s1758_s30  ;;  %v1615_v43 = vpop.f32.mrb[17].mxu0 }
 0x803   : >> { %v1140_v44 = vpop.f32.mrb[18].mxu0 }
 0x804   : >> { %v1616_v45 = vpop.f32.mrb[19].mxu0 }
 0x847   : >> { %v1145_v46 = vpop.permute.xlu1 %1144 }
 0x848   : >> { %v1155_v48 = vsel %vm691_vm7, %v801_v21, %v1145_v46 }
 0x86c   : >> { %v1149_v47 = vpop.permute.xlu0 %1148 }
 0x86d   : >> { %v1156_v49 = vsel %vm546_vm4, %v1155_v48, %v1149_v47 }
 0x874   : >> { %v1153_v50 = vpop.permute.xlu1 %1152 }
 0x875   : >> { %v1158_v51 = vsel %vm1157_vm9, %v1156_v49, %v1153_v50 }
 0x876   : >> { %v1163_v52 = vpack.c.bf16 %v1158_v51, %v1158_v51 }
 0x878   : >> { %1622 = vmatmul.mubr.msk.bf16.vlgmr.msra.gmra.mrb[16].mxu1 %vm643_vm6, %v1163_v52 }
 0x879   : >> { %1641 = vmatprep.mubr.msk.bf16.mxu1 %vm1744_vm5, %v1743_v25  ;;  %1634 = vmatpush3.bf16.msra.mxu1 %v1310_v29 }
 0x87a   : >> { %1635 = vmatprep.subr.bf16.mxu1 %v1743_v25 }
 0x87d   : >> { %1636 = vmatpush3.bf16.msra.mxu1 %v1311_v32 }
 0x87e   : >> { %1637 = vmatprep.subr.bf16.mxu1 %v1743_v25 }
 0x881   : >> { %1638 = vmatpush3.bf16.msra.mxu1 %v1312_v36 }
 0x882   : >> { %1639 = vmatprep.subr.bf16.mxu1 %v1743_v25 }
 0x885   : >> { %1640 = vmatpush3.bf16.msra.mxu1 %v1313_v39 }
 0x94b   : >> { %v1207_v53 = vpop.f32.mrb[16].mxu1 }
 0x94c   : >> { %v1208_v54 = vadd.f32 %v1840_v2, %v1207_v53  ;;  %v1623_v55 = vpop.f32.mrb[17].mxu1 }
 0x94d   : >> { %v1210_v56 = vpop.f32.mrb[18].mxu1 }
 0x94e   : >> { %v1624_v57 = vpop.f32.mrb[19].mxu1  ;;  %v1213_v58 = vadd.f32 %v1733_v17, %v1208_v54  ;;  %v1240_v17 = vld [vmem:[%s2151_s9 + $0x10] sm:$0xff] }
 0x94f   : >> { %v1244_v14 = vpack.c.bf16 %v1241_v13, %v1240_v17 }
 0x950   : >> { %v1214_v59 = vsel %vm643_vm6, %v1213_v58, 0.0 }
 0x951   : >> { %1215 = vadd.xlane.f32.xlu0 %v1214_v59  ;;  %1628 = vmatpush3.bf16.msra.mxu0 %v1244_v14 }
 0x9de   : >> { %v1216_v60 = vpop.xlane.xlu0 %1215 }
 0x9df   : >> { %v1218_v35 = vmul.f32 0.03125, %v1216_v60 }
 0x9e1   : >> { %v1219_v61 = vsub.f32 %v1213_v58, %v1218_v35 }
 0x9e3   : >> { %v1220_v62 = vmul.f32 %v1219_v61, %v1219_v61 }
 0x9e5   : >> { %v1221_v63 = vsel %vm643_vm6, %v1220_v62, 0.0 }
 0x9e6   : >> { %1222 = vadd.xlane.f32.xlu1 %v1221_v63 }
 0xa73   : >> { %v1223_v15 = vpop.xlane.xlu1 %1222 }
 0xa74   : >> { %v1224_v16 = vmul.f32 0.03125, %v1223_v15 }
 0xa76   : >> { %v1225_v18 = vadd.f32 1e-12, %v1224_v16 }
 0xa78   : >> { %1709 = vrsqrt.f32 %v1225_v18 }
 0xa82   : >> { %v1710_v19 = vpop.eup %1709 }
 0xa83   : >> { %v1227_v21 = vmul.f32 %v1710_v19, %v1219_v61 }
 0xa85   : >> { %v1232_v22 = vmul.f32 %v1845_v3, %v1227_v21 }
 0xa87   : >> { %v1237_v23 = vadd.f32 %v1850_v4, %v1232_v22 }
 0xa89   : >> { %v1242_v24 = vpack.c.bf16 %v1237_v23, %v1237_v23 }
 0xa8b   : >> { %1630 = vmatmul.mubr.msk.bf16.vlgmr.msra.gmra.mrb[20].mxu0 %vm643_vm6, %v1242_v24 }
 0xb5e   : >> { %v1286_v40 = vpop.f32.mrb[20].mxu0 }
 0xb5f   : >> { %v1287_v41 = vadd.f32 %v1857_v5, %v1286_v40  ;;  %v1631_v42 = vpop.f32.mrb[21].mxu0 }
 0xb60   : >> { %v1289_v43 = vpop.f32.mrb[22].mxu0 }
 0xb61   : >> { %v1293_v44 = vmul.f32 0.044715, %v1287_v41  ;;  %v1632_v45 = vpop.f32.mrb[23].mxu0  ;;  %v1292_v51 = vmul.f32 0.5, %v1287_v41 }
 0xb63   : >> { %v1294_v46 = vmul.f32 %v1293_v44, %v1287_v41 }
 0xb65   : >> { %v1295_v47 = vmul.f32 %v1294_v46, %v1287_v41 }
 0xb67   : >> { %v1296_v48 = vadd.f32 %v1295_v47, %v1287_v41 }
 0xb69   : >> { %v1297_v49 = vmul.f32 0.7978846, %v1296_v48 }
 0xb6b   : >> { %1711 = vtanh.f32 %v1297_v49 }
 0xb75   : >> { %v1712_v50 = vpop.eup %1711 }
 0xb76   : >> { %v1299_v52 = vadd.f32 1.0, %v1712_v50 }
 0xb78   : >> { %v1300_v53 = vmul.f32 %v1299_v52, %v1292_v51 }
 0xb7a   : >> { %v1309_v54 = vpack.c.bf16 %v1300_v53, %v1300_v53 }
 0xb7c   : >> { %1642 = vmatmul.mubr.msk.bf16.vlgmr.msra.gmra.mrb[20].mxu1 %vm501_vm3, %v1309_v54 }
 0xc4f   : >> { %v1355_v25 = vpop.f32.mrb[20].mxu1 }
 0xc50   : >> { %v1356_v55 = vadd.f32 %v1862_v6, %v1355_v25  ;;  %v1643_v56 = vpop.f32.mrb[21].mxu1 }
 0xc51   : >> { %v1358_v57 = vpop.f32.mrb[22].mxu1 }
 0xc52   : >> { %v1644_v58 = vpop.f32.mrb[23].mxu1  ;;  %v1361_v59 = vadd.f32 %v1356_v55, %v1237_v23 }
 0xc54   : >> { %v1362_v60 = vsel %vm643_vm6, %v1361_v59, 0.0 }
 0xc55   : >> { %1363 = vadd.xlane.f32.xlu0 %v1362_v60 }
 0xce2   : >> { %v1364_v35 = vpop.xlane.xlu0 %1363 }
 0xce3   : >> { %v1365_v61 = vmul.f32 0.03125, %v1364_v35 }
 0xce5   : >> { %v1366_v62 = vsub.f32 %v1361_v59, %v1365_v61 }
 0xce7   : >> { %v1367_v63 = vmul.f32 %v1366_v62, %v1366_v62 }
 0xce9   : >> { %v1368_v1 = vsel %vm643_vm6, %v1367_v63, 0.0 }
 0xcea   : >> { %1369 = vadd.xlane.f32.xlu0 %v1368_v1 }
 0xd77   : >> { %v1370_v10 = vpop.xlane.xlu0 %1369 }
 0xd78   : >> { %v1371_v12 = vmul.f32 0.03125, %v1370_v10 }
 0xd7a   : >> { %v1372_v17 = vadd.f32 1e-12, %v1371_v12 }
 0xd7c   : >> { %1713 = vrsqrt.f32 %v1372_v17 }
 0xd86   : >> { %v1714_v13 = vpop.eup %1713 }
 0xd87   : >> { %v1374_v14 = vmul.f32 %v1714_v13, %v1366_v62  ;;  %629 = sbr.rel (!%p627_p4) target bundleno = 895 (0x37f), region = 111 }
 0xd89   : >> { %v1379_v15 = vmul.f32 %v1867_v7, %v1374_v14 }
 0xd8b   : >> { %v1384_v16 = vadd.f32 %v1872_v8, %v1379_v15  }
 0xd8d   : >> { %v2155_v17 = vmov %v1384_v16  ;;  %v1385_v18 = vmul.f32 (%p627_p4), %v1384_v16, %v1877_v9 }
 0xd8f   : > { %v1387_v19 = vsel %vm1386_vm10, %v1385_v18, 0.0 }
 0xd90   : > { %1388 = vadd.xlane.f32.xlu0 %v1387_v19 }
 0xe1d   : > { %v1389_v21 = vpop.xlane.xlu0 %1388 }
 0xe1e   : > { %v1390_v22 = vadd.f32 %v1389_v21, %v1887_v11 }
 0xe20   : > { %1392 = vst.msk [vmem:[%s437_s24] sm:$0x1] %vm1391_vm11, %v1390_v22 }
 0xe21 PF: > { %s22_s21 = sadd.s32 1, %s1729_s21  }
 0xe22   : > { %p19_p5 = scmp.ge.s32.totalorder %s22_s21, 4  }
 0xe24   :  { %21 = sbr.rel (!%p19_p5) target bundleno = 1 (0x1), region = 122 }

</bundles_post_ra>
